<compile_context>
chip_gen: v7x
topology: tpu7x:2x2x1
jax: 0.10.0
libtpu: 0.0.40
codegen_flags: <defaults>
</compile_context>

<pallas_src>
import jax
import jax.numpy as jnp
from jax import lax
from jax.experimental import pallas as pl
from jax.experimental.pallas import tpu as pltpu

_LANES = 128
_SUB_ROWS = 32          # sub-tile rows; int8 native VMEM tile is (32, 128)


def _round_up(x, m):
    return ((x + m - 1) // m) * m


def bt_kernel(team_ref, skill_ref, out_ref):
    # team_ref : (team_size, block_rows, 128) int8/int16/int32  VMEM (matches on lanes)
    # skill_ref: (n_hero,)                    f32               SMEM (scalar skill table)
    # out_ref  : (block_rows, 128)            f32               VMEM (lane-dense team skills)
    n_hero = skill_ref.shape[0]
    team_size, block_rows, _ = team_ref.shape
    sub = min(_SUB_ROWS, block_rows)
    n_sub = block_rows // sub
    # Full unroll for small hero tables (LLO visibility), modest factor otherwise.
    hero_unroll = True if n_hero <= 32 else 8

    # TODO(synk): for embedding-sized n_hero, replace the O(n_hero) compare loop
    # with a VMEM-table jnp.take lane gather (verify Mosaic lowering) and move
    # the skill table out of SMEM (1-D SMEM pads to next-pow2 bytes).

    @pl.loop(0, n_sub)
    def _(i):
        r0 = pl.multiple_of(i * sub, sub)
        acc = jnp.zeros((sub, _LANES), jnp.float32)
        for t in range(team_size):            # tiny static loop over team slots
            # One slot's ids for this sub-tile; widen in-register (i8 -> i32).
            ids = team_ref[t, pl.ds(r0, sub), :].astype(jnp.int32)

            def gather_hero(h, slot):
                # masked select-gather: slot <- skill[h] where ids == h
                return jnp.where(ids == h, skill_ref[h], slot)

            slot = lax.fori_loop(0, n_hero, gather_hero,
                                 jnp.zeros((sub, _LANES), jnp.float32),
                                 unroll=hero_unroll)
            acc = acc + slot
        out_ref[pl.ds(r0, sub), :] = acc


def bt_forward(team, skill, *, block_rows=1024):
    """team: (n_match, team_size) int, skill: (n_hero, 1) f32 -> (n_match, 1) f32."""
    n_match, team_size = team.shape
    n_hero = skill.shape[0]

    # Narrowest id dtype that holds every hero id: 4x (2x) less HBM traffic and
    # VMEM for the team tensor than int32.
    if n_hero <= 127:
        id_dtype = jnp.int8
    elif n_hero <= 32767:
        id_dtype = jnp.int16
    else:
        id_dtype = jnp.int32

    # ---- layout plumbing: matches on the lane axis, lane-dense output ----
    rows_needed = pl.cdiv(n_match, _LANES)
    block_rows = max(_SUB_ROWS, _round_up(block_rows, _SUB_ROWS))
    if rows_needed > 2 * _SUB_ROWS:
        # Keep >= 2 grid steps when there is enough work so megacore / v7x's
        # two TensorCores can both take a share of the "parallel" axis.
        block_rows = min(block_rows, _round_up(pl.cdiv(rows_needed, 2), _SUB_ROWS))
    block_rows = min(block_rows, _round_up(rows_needed, _SUB_ROWS))
    rows_pad = _round_up(rows_needed, block_rows)
    n_pad = rows_pad * _LANES

    # Single fused XLA pass at the *narrow* dtype: cast -> pad -> transpose.
    team_ids = team.astype(id_dtype)
    team_pad = jnp.pad(team_ids, ((0, n_pad - n_match), (0, 0)))
    team_t = team_pad.T.reshape(team_size, rows_pad, _LANES)   # (T, rows, 128)
    skill_vec = skill.reshape(-1).astype(jnp.float32)          # (n_hero,) -> SMEM

    grid = (rows_pad // block_rows,)
    out2d = pl.pallas_call(
        bt_kernel,
        out_shape=jax.ShapeDtypeStruct((rows_pad, _LANES), jnp.float32),
        grid_spec=pltpu.PrefetchScalarGridSpec(
            num_scalar_prefetch=0,
            grid=grid,
            in_specs=[
                pl.BlockSpec((team_size, block_rows, _LANES), lambda i: (0, i, 0)),
                pl.BlockSpec(memory_space=pltpu.MemorySpace.SMEM),
            ],
            out_specs=pl.BlockSpec((block_rows, _LANES), lambda i: (i, 0)),
        ),
        compiler_params=pltpu.CompilerParams(
            dimension_semantics=("parallel",),
        ),
    )(team_t, skill_vec)

    # back to PyTorch layout: (n_match, 1)
    return out2d.reshape(-1)[:n_match].reshape(n_match, 1)


if __name__ == "__main__":
    key = jax.random.PRNGKey(0)
    k_skill, k_team, k_team2 = jax.random.split(key, 3)

    n_hero = 16
    n_match = 8
    team_size = 5

    # nn.Embedding default init: N(0, 1)
    skill = jax.random.normal(k_skill, (n_hero, 1), dtype=jnp.float32)
    team = jax.random.randint(k_team, (n_match, team_size), 0, n_hero, dtype=jnp.int32)

    out = bt_forward(team, skill)
    out = jax.block_until_ready(out)

    # Pure-JAX reference: skill[team].sum(axis=1, keepdims=True)
    ref = skill[team, 0].sum(axis=1, keepdims=True)
    assert out.shape == (n_match, 1)
    assert jnp.allclose(out, ref, atol=1e-5, rtol=1e-5), (out, ref)

    # Second (still tiny) check that exercises multiple grid steps and
    # multiple in-kernel sub-tiles.
    n_match2 = 20000
    team2 = jax.random.randint(k_team2, (n_match2, team_size), 0, n_hero, dtype=jnp.int32)
    out2 = jax.block_until_ready(bt_forward(team2, skill))
    ref2 = skill[team2, 0].sum(axis=1, keepdims=True)
    assert out2.shape == (n_match2, 1)
    assert jnp.allclose(out2, ref2, atol=1e-5, rtol=1e-5)

    print("KERNEL_OK")
</pallas_src>

<mosaic_0001>
module attributes {stable_mosaic.version = 11 : i64} {
  func.func @bt_kernel(%arg0: i32, %arg1: memref<5x32x128xi8, #tpu.memory_space<vmem>>, %arg2: memref<16xf32, #tpu.memory_space<smem>>, %arg3: memref<32x128xf32, #tpu.memory_space<vmem>>) attributes {dimension_semantics = [#tpu.dimension_semantics<parallel>], iteration_bounds = array<i64: 1>, scalar_prefetch = 0 : i64, scratch_operands = 0 : i64, tpu.core_type = #tpu.core_type<tc>, window_params = [{transform_indices = @transform_0, window_bounds = array<i64: 5, 32, 128>}, {transform_indices = @transform_1, window_bounds = array<i64: 16>}, {transform_indices = @transform_2, window_bounds = array<i64: 32, 128>}]} {
    %c0_i32 = arith.constant 0 : i32
    %c1_i32 = arith.constant 1 : i32
    %0 = arith.muli %c0_i32, %c1_i32 : i32
    %c0_i32_0 = arith.constant 0 : i32
    %1 = arith.addi %c0_i32_0, %0 : i32
    %c32_i32 = arith.constant 32 : i32
    %2 = arith.muli %1, %c32_i32 : i32
    %3 = tpu.assume_multiple %2, 32 : i32
    %cst = arith.constant 0.000000e+00 : f32
    %4 = vector.broadcast %cst : f32 to vector<32x128xf32>
    %c0 = arith.constant 0 : index
    %5 = arith.index_cast %3 : i32 to index
    %c0_1 = arith.constant 0 : index
    %6 = vector.load %arg1[%c0, %5, %c0_1] : memref<5x32x128xi8, #tpu.memory_space<vmem>>, vector<1x32x128xi8>
    %7 = vector.shape_cast %6 : vector<1x32x128xi8> to vector<32x128xi8>
    %8 = arith.extsi %7 : vector<32x128xi8> to vector<32x128xi32>
    %cst_2 = arith.constant 0.000000e+00 : f32
    %9 = vector.broadcast %cst_2 : f32 to vector<32x128xf32>
    %c0_i32_3 = arith.constant 0 : i32
    %10 = vector.broadcast %c0_i32_3 : i32 to vector<32x128xi32>
    %11 = arith.cmpi eq, %8, %10 : vector<32x128xi32>
    %12 = arith.index_cast %c0_i32_3 : i32 to index
    %13 = memref.load %arg2[%12] : memref<16xf32, #tpu.memory_space<smem>>
    %14 = vector.broadcast %13 : f32 to vector<32x128xf32>
    %15 = arith.select %11, %14, %9 : vector<32x128xi1>, vector<32x128xf32>
    %c1_i32_4 = arith.constant 1 : i32
    %16 = vector.broadcast %c1_i32_4 : i32 to vector<32x128xi32>
    %17 = arith.cmpi eq, %8, %16 : vector<32x128xi32>
    %18 = arith.index_cast %c1_i32_4 : i32 to index
    %19 = memref.load %arg2[%18] : memref<16xf32, #tpu.memory_space<smem>>
    %20 = vector.broadcast %19 : f32 to vector<32x128xf32>
    %21 = arith.select %17, %20, %15 : vector<32x128xi1>, vector<32x128xf32>
    %c2_i32 = arith.constant 2 : i32
    %22 = vector.broadcast %c2_i32 : i32 to vector<32x128xi32>
    %23 = arith.cmpi eq, %8, %22 : vector<32x128xi32>
    %24 = arith.index_cast %c2_i32 : i32 to index
    %25 = memref.load %arg2[%24] : memref<16xf32, #tpu.memory_space<smem>>
    %26 = vector.broadcast %25 : f32 to vector<32x128xf32>
    %27 = arith.select %23, %26, %21 : vector<32x128xi1>, vector<32x128xf32>
    %c3_i32 = arith.constant 3 : i32
    %28 = vector.broadcast %c3_i32 : i32 to vector<32x128xi32>
    %29 = arith.cmpi eq, %8, %28 : vector<32x128xi32>
    %30 = arith.index_cast %c3_i32 : i32 to index
    %31 = memref.load %arg2[%30] : memref<16xf32, #tpu.memory_space<smem>>
    %32 = vector.broadcast %31 : f32 to vector<32x128xf32>
    %33 = arith.select %29, %32, %27 : vector<32x128xi1>, vector<32x128xf32>
    %c4_i32 = arith.constant 4 : i32
    %34 = vector.broadcast %c4_i32 : i32 to vector<32x128xi32>
    %35 = arith.cmpi eq, %8, %34 : vector<32x128xi32>
    %36 = arith.index_cast %c4_i32 : i32 to index
    %37 = memref.load %arg2[%36] : memref<16xf32, #tpu.memory_space<smem>>
    %38 = vector.broadcast %37 : f32 to vector<32x128xf32>
    %39 = arith.select %35, %38, %33 : vector<32x128xi1>, vector<32x128xf32>
    %c5_i32 = arith.constant 5 : i32
    %40 = vector.broadcast %c5_i32 : i32 to vector<32x128xi32>
    %41 = arith.cmpi eq, %8, %40 : vector<32x128xi32>
    %42 = arith.index_cast %c5_i32 : i32 to index
    %43 = memref.load %arg2[%42] : memref<16xf32, #tpu.memory_space<smem>>
    %44 = vector.broadcast %43 : f32 to vector<32x128xf32>
    %45 = arith.select %41, %44, %39 : vector<32x128xi1>, vector<32x128xf32>
    %c6_i32 = arith.constant 6 : i32
    %46 = vector.broadcast %c6_i32 : i32 to vector<32x128xi32>
    %47 = arith.cmpi eq, %8, %46 : vector<32x128xi32>
    %48 = arith.index_cast %c6_i32 : i32 to index
    %49 = memref.load %arg2[%48] : memref<16xf32, #tpu.memory_space<smem>>
    %50 = vector.broadcast %49 : f32 to vector<32x128xf32>
    %51 = arith.select %47, %50, %45 : vector<32x128xi1>, vector<32x128xf32>
    %c7_i32 = arith.constant 7 : i32
    %52 = vector.broadcast %c7_i32 : i32 to vector<32x128xi32>
    %53 = arith.cmpi eq, %8, %52 : vector<32x128xi32>
    %54 = arith.index_cast %c7_i32 : i32 to index
    %55 = memref.load %arg2[%54] : memref<16xf32, #tpu.memory_space<smem>>
    %56 = vector.broadcast %55 : f32 to vector<32x128xf32>
    %57 = arith.select %53, %56, %51 : vector<32x128xi1>, vector<32x128xf32>
    %c8_i32 = arith.constant 8 : i32
    %58 = vector.broadcast %c8_i32 : i32 to vector<32x128xi32>
    %59 = arith.cmpi eq, %8, %58 : vector<32x128xi32>
    %60 = arith.index_cast %c8_i32 : i32 to index
    %61 = memref.load %arg2[%60] : memref<16xf32, #tpu.memory_space<smem>>
    %62 = vector.broadcast %61 : f32 to vector<32x128xf32>
    %63 = arith.select %59, %62, %57 : vector<32x128xi1>, vector<32x128xf32>
    %c9_i32 = arith.constant 9 : i32
    %64 = vector.broadcast %c9_i32 : i32 to vector<32x128xi32>
    %65 = arith.cmpi eq, %8, %64 : vector<32x128xi32>
    %66 = arith.index_cast %c9_i32 : i32 to index
    %67 = memref.load %arg2[%66] : memref<16xf32, #tpu.memory_space<smem>>
    %68 = vector.broadcast %67 : f32 to vector<32x128xf32>
    %69 = arith.select %65, %68, %63 : vector<32x128xi1>, vector<32x128xf32>
    %c10_i32 = arith.constant 10 : i32
    %70 = vector.broadcast %c10_i32 : i32 to vector<32x128xi32>
    %71 = arith.cmpi eq, %8, %70 : vector<32x128xi32>
    %72 = arith.index_cast %c10_i32 : i32 to index
    %73 = memref.load %arg2[%72] : memref<16xf32, #tpu.memory_space<smem>>
    %74 = vector.broadcast %73 : f32 to vector<32x128xf32>
    %75 = arith.select %71, %74, %69 : vector<32x128xi1>, vector<32x128xf32>
    %c11_i32 = arith.constant 11 : i32
    %76 = vector.broadcast %c11_i32 : i32 to vector<32x128xi32>
    %77 = arith.cmpi eq, %8, %76 : vector<32x128xi32>
    %78 = arith.index_cast %c11_i32 : i32 to index
    %79 = memref.load %arg2[%78] : memref<16xf32, #tpu.memory_space<smem>>
    %80 = vector.broadcast %79 : f32 to vector<32x128xf32>
    %81 = arith.select %77, %80, %75 : vector<32x128xi1>, vector<32x128xf32>
    %c12_i32 = arith.constant 12 : i32
    %82 = vector.broadcast %c12_i32 : i32 to vector<32x128xi32>
    %83 = arith.cmpi eq, %8, %82 : vector<32x128xi32>
    %84 = arith.index_cast %c12_i32 : i32 to index
    %85 = memref.load %arg2[%84] : memref<16xf32, #tpu.memory_space<smem>>
    %86 = vector.broadcast %85 : f32 to vector<32x128xf32>
    %87 = arith.select %83, %86, %81 : vector<32x128xi1>, vector<32x128xf32>
    %c13_i32 = arith.constant 13 : i32
    %88 = vector.broadcast %c13_i32 : i32 to vector<32x128xi32>
    %89 = arith.cmpi eq, %8, %88 : vector<32x128xi32>
    %90 = arith.index_cast %c13_i32 : i32 to index
    %91 = memref.load %arg2[%90] : memref<16xf32, #tpu.memory_space<smem>>
    %92 = vector.broadcast %91 : f32 to vector<32x128xf32>
    %93 = arith.select %89, %92, %87 : vector<32x128xi1>, vector<32x128xf32>
    %c14_i32 = arith.constant 14 : i32
    %94 = vector.broadcast %c14_i32 : i32 to vector<32x128xi32>
    %95 = arith.cmpi eq, %8, %94 : vector<32x128xi32>
    %96 = arith.index_cast %c14_i32 : i32 to index
    %97 = memref.load %arg2[%96] : memref<16xf32, #tpu.memory_space<smem>>
    %98 = vector.broadcast %97 : f32 to vector<32x128xf32>
    %99 = arith.select %95, %98, %93 : vector<32x128xi1>, vector<32x128xf32>
    %c15_i32 = arith.constant 15 : i32
    %100 = vector.broadcast %c15_i32 : i32 to vector<32x128xi32>
    %101 = arith.cmpi eq, %8, %100 : vector<32x128xi32>
    %102 = arith.index_cast %c15_i32 : i32 to index
    %103 = memref.load %arg2[%102] : memref<16xf32, #tpu.memory_space<smem>>
    %104 = vector.broadcast %103 : f32 to vector<32x128xf32>
    %105 = arith.select %101, %104, %99 : vector<32x128xi1>, vector<32x128xf32>
    %c16_i32 = arith.constant 16 : i32
    %106 = arith.addf %4, %105 : vector<32x128xf32>
    %c1 = arith.constant 1 : index
    %107 = arith.index_cast %3 : i32 to index
    %c0_5 = arith.constant 0 : index
    %108 = vector.load %arg1[%c1, %107, %c0_5] : memref<5x32x128xi8, #tpu.memory_space<vmem>>, vector<1x32x128xi8>
    %109 = vector.shape_cast %108 : vector<1x32x128xi8> to vector<32x128xi8>
    %110 = arith.extsi %109 : vector<32x128xi8> to vector<32x128xi32>
    %cst_6 = arith.constant 0.000000e+00 : f32
    %111 = vector.broadcast %cst_6 : f32 to vector<32x128xf32>
    %c0_i32_7 = arith.constant 0 : i32
    %112 = vector.broadcast %c0_i32_7 : i32 to vector<32x128xi32>
    %113 = arith.cmpi eq, %110, %112 : vector<32x128xi32>
    %114 = arith.index_cast %c0_i32_7 : i32 to index
    %115 = memref.load %arg2[%114] : memref<16xf32, #tpu.memory_space<smem>>
    %116 = vector.broadcast %115 : f32 to vector<32x128xf32>
    %117 = arith.select %113, %116, %111 : vector<32x128xi1>, vector<32x128xf32>
    %c1_i32_8 = arith.constant 1 : i32
    %118 = vector.broadcast %c1_i32_8 : i32 to vector<32x128xi32>
    %119 = arith.cmpi eq, %110, %118 : vector<32x128xi32>
    %120 = arith.index_cast %c1_i32_8 : i32 to index
    %121 = memref.load %arg2[%120] : memref<16xf32, #tpu.memory_space<smem>>
    %122 = vector.broadcast %121 : f32 to vector<32x128xf32>
    %123 = arith.select %119, %122, %117 : vector<32x128xi1>, vector<32x128xf32>
    %c2_i32_9 = arith.constant 2 : i32
    %124 = vector.broadcast %c2_i32_9 : i32 to vector<32x128xi32>
    %125 = arith.cmpi eq, %110, %124 : vector<32x128xi32>
    %126 = arith.index_cast %c2_i32_9 : i32 to index
    %127 = memref.load %arg2[%126] : memref<16xf32, #tpu.memory_space<smem>>
    %128 = vector.broadcast %127 : f32 to vector<32x128xf32>
    %129 = arith.select %125, %128, %123 : vector<32x128xi1>, vector<32x128xf32>
    %c3_i32_10 = arith.constant 3 : i32
    %130 = vector.broadcast %c3_i32_10 : i32 to vector<32x128xi32>
    %131 = arith.cmpi eq, %110, %130 : vector<32x128xi32>
    %132 = arith.index_cast %c3_i32_10 : i32 to index
    %133 = memref.load %arg2[%132] : memref<16xf32, #tpu.memory_space<smem>>
    %134 = vector.broadcast %133 : f32 to vector<32x128xf32>
    %135 = arith.select %131, %134, %129 : vector<32x128xi1>, vector<32x128xf32>
    %c4_i32_11 = arith.constant 4 : i32
    %136 = vector.broadcast %c4_i32_11 : i32 to vector<32x128xi32>
    %137 = arith.cmpi eq, %110, %136 : vector<32x128xi32>
    %138 = arith.index_cast %c4_i32_11 : i32 to index
    %139 = memref.load %arg2[%138] : memref<16xf32, #tpu.memory_space<smem>>
    %140 = vector.broadcast %139 : f32 to vector<32x128xf32>
    %141 = arith.select %137, %140, %135 : vector<32x128xi1>, vector<32x128xf32>
    %c5_i32_12 = arith.constant 5 : i32
    %142 = vector.broadcast %c5_i32_12 : i32 to vector<32x128xi32>
    %143 = arith.cmpi eq, %110, %142 : vector<32x128xi32>
    %144 = arith.index_cast %c5_i32_12 : i32 to index
    %145 = memref.load %arg2[%144] : memref<16xf32, #tpu.memory_space<smem>>
    %146 = vector.broadcast %145 : f32 to vector<32x128xf32>
    %147 = arith.select %143, %146, %141 : vector<32x128xi1>, vector<32x128xf32>
    %c6_i32_13 = arith.constant 6 : i32
    %148 = vector.broadcast %c6_i32_13 : i32 to vector<32x128xi32>
    %149 = arith.cmpi eq, %110, %148 : vector<32x128xi32>
    %150 = arith.index_cast %c6_i32_13 : i32 to index
    %151 = memref.load %arg2[%150] : memref<16xf32, #tpu.memory_space<smem>>
    %152 = vector.broadcast %151 : f32 to vector<32x128xf32>
    %153 = arith.select %149, %152, %147 : vector<32x128xi1>, vector<32x128xf32>
    %c7_i32_14 = arith.constant 7 : i32
    %154 = vector.broadcast %c7_i32_14 : i32 to vector<32x128xi32>
    %155 = arith.cmpi eq, %110, %154 : vector<32x128xi32>
    %156 = arith.index_cast %c7_i32_14 : i32 to index
    %157 = memref.load %arg2[%156] : memref<16xf32, #tpu.memory_space<smem>>
    %158 = vector.broadcast %157 : f32 to vector<32x128xf32>
    %159 = arith.select %155, %158, %153 : vector<32x128xi1>, vector<32x128xf32>
    %c8_i32_15 = arith.constant 8 : i32
    %160 = vector.broadcast %c8_i32_15 : i32 to vector<32x128xi32>
    %161 = arith.cmpi eq, %110, %160 : vector<32x128xi32>
    %162 = arith.index_cast %c8_i32_15 : i32 to index
    %163 = memref.load %arg2[%162] : memref<16xf32, #tpu.memory_space<smem>>
    %164 = vector.broadcast %163 : f32 to vector<32x128xf32>
    %165 = arith.select %161, %164, %159 : vector<32x128xi1>, vector<32x128xf32>
    %c9_i32_16 = arith.constant 9 : i32
    %166 = vector.broadcast %c9_i32_16 : i32 to vector<32x128xi32>
    %167 = arith.cmpi eq, %110, %166 : vector<32x128xi32>
    %168 = arith.index_cast %c9_i32_16 : i32 to index
    %169 = memref.load %arg2[%168] : memref<16xf32, #tpu.memory_space<smem>>
    %170 = vector.broadcast %169 : f32 to vector<32x128xf32>
    %171 = arith.select %167, %170, %165 : vector<32x128xi1>, vector<32x128xf32>
    %c10_i32_17 = arith.constant 10 : i32
    %172 = vector.broadcast %c10_i32_17 : i32 to vector<32x128xi32>
    %173 = arith.cmpi eq, %110, %172 : vector<32x128xi32>
    %174 = arith.index_cast %c10_i32_17 : i32 to index
    %175 = memref.load %arg2[%174] : memref<16xf32, #tpu.memory_space<smem>>
    %176 = vector.broadcast %175 : f32 to vector<32x128xf32>
    %177 = arith.select %173, %176, %171 : vector<32x128xi1>, vector<32x128xf32>
    %c11_i32_18 = arith.constant 11 : i32
    %178 = vector.broadcast %c11_i32_18 : i32 to vector<32x128xi32>
    %179 = arith.cmpi eq, %110, %178 : vector<32x128xi32>
    %180 = arith.index_cast %c11_i32_18 : i32 to index
    %181 = memref.load %arg2[%180] : memref<16xf32, #tpu.memory_space<smem>>
    %182 = vector.broadcast %181 : f32 to vector<32x128xf32>
    %183 = arith.select %179, %182, %177 : vector<32x128xi1>, vector<32x128xf32>
    %c12_i32_19 = arith.constant 12 : i32
    %184 = vector.broadcast %c12_i32_19 : i32 to vector<32x128xi32>
    %185 = arith.cmpi eq, %110, %184 : vector<32x128xi32>
    %186 = arith.index_cast %c12_i32_19 : i32 to index
    %187 = memref.load %arg2[%186] : memref<16xf32, #tpu.memory_space<smem>>
    %188 = vector.broadcast %187 : f32 to vector<32x128xf32>
    %189 = arith.select %185, %188, %183 : vector<32x128xi1>, vector<32x128xf32>
    %c13_i32_20 = arith.constant 13 : i32
    %190 = vector.broadcast %c13_i32_20 : i32 to vector<32x128xi32>
    %191 = arith.cmpi eq, %110, %190 : vector<32x128xi32>
    %192 = arith.index_cast %c13_i32_20 : i32 to index
    %193 = memref.load %arg2[%192] : memref<16xf32, #tpu.memory_space<smem>>
    %194 = vector.broadcast %193 : f32 to vector<32x128xf32>
    %195 = arith.select %191, %194, %189 : vector<32x128xi1>, vector<32x128xf32>
    %c14_i32_21 = arith.constant 14 : i32
    %196 = vector.broadcast %c14_i32_21 : i32 to vector<32x128xi32>
    %197 = arith.cmpi eq, %110, %196 : vector<32x128xi32>
    %198 = arith.index_cast %c14_i32_21 : i32 to index
    %199 = memref.load %arg2[%198] : memref<16xf32, #tpu.memory_space<smem>>
    %200 = vector.broadcast %199 : f32 to vector<32x128xf32>
    %201 = arith.select %197, %200, %195 : vector<32x128xi1>, vector<32x128xf32>
    %c15_i32_22 = arith.constant 15 : i32
    %202 = vector.broadcast %c15_i32_22 : i32 to vector<32x128xi32>
    %203 = arith.cmpi eq, %110, %202 : vector<32x128xi32>
    %204 = arith.index_cast %c15_i32_22 : i32 to index
    %205 = memref.load %arg2[%204] : memref<16xf32, #tpu.memory_space<smem>>
    %206 = vector.broadcast %205 : f32 to vector<32x128xf32>
    %207 = arith.select %203, %206, %201 : vector<32x128xi1>, vector<32x128xf32>
    %c16_i32_23 = arith.constant 16 : i32
    %208 = arith.addf %106, %207 : vector<32x128xf32>
    %c2 = arith.constant 2 : index
    %209 = arith.index_cast %3 : i32 to index
    %c0_24 = arith.constant 0 : index
    %210 = vector.load %arg1[%c2, %209, %c0_24] : memref<5x32x128xi8, #tpu.memory_space<vmem>>, vector<1x32x128xi8>
    %211 = vector.shape_cast %210 : vector<1x32x128xi8> to vector<32x128xi8>
    %212 = arith.extsi %211 : vector<32x128xi8> to vector<32x128xi32>
    %cst_25 = arith.constant 0.000000e+00 : f32
    %213 = vector.broadcast %cst_25 : f32 to vector<32x128xf32>
    %c0_i32_26 = arith.constant 0 : i32
    %214 = vector.broadcast %c0_i32_26 : i32 to vector<32x128xi32>
    %215 = arith.cmpi eq, %212, %214 : vector<32x128xi32>
    %216 = arith.index_cast %c0_i32_26 : i32 to index
    %217 = memref.load %arg2[%216] : memref<16xf32, #tpu.memory_space<smem>>
    %218 = vector.broadcast %217 : f32 to vector<32x128xf32>
    %219 = arith.select %215, %218, %213 : vector<32x128xi1>, vector<32x128xf32>
    %c1_i32_27 = arith.constant 1 : i32
    %220 = vector.broadcast %c1_i32_27 : i32 to vector<32x128xi32>
    %221 = arith.cmpi eq, %212, %220 : vector<32x128xi32>
    %222 = arith.index_cast %c1_i32_27 : i32 to index
    %223 = memref.load %arg2[%222] : memref<16xf32, #tpu.memory_space<smem>>
    %224 = vector.broadcast %223 : f32 to vector<32x128xf32>
    %225 = arith.select %221, %224, %219 : vector<32x128xi1>, vector<32x128xf32>
    %c2_i32_28 = arith.constant 2 : i32
    %226 = vector.broadcast %c2_i32_28 : i32 to vector<32x128xi32>
    %227 = arith.cmpi eq, %212, %226 : vector<32x128xi32>
    %228 = arith.index_cast %c2_i32_28 : i32 to index
    %229 = memref.load %arg2[%228] : memref<16xf32, #tpu.memory_space<smem>>
    %230 = vector.broadcast %229 : f32 to vector<32x128xf32>
    %231 = arith.select %227, %230, %225 : vector<32x128xi1>, vector<32x128xf32>
    %c3_i32_29 = arith.constant 3 : i32
    %232 = vector.broadcast %c3_i32_29 : i32 to vector<32x128xi32>
    %233 = arith.cmpi eq, %212, %232 : vector<32x128xi32>
    %234 = arith.index_cast %c3_i32_29 : i32 to index
    %235 = memref.load %arg2[%234] : memref<16xf32, #tpu.memory_space<smem>>
    %236 = vector.broadcast %235 : f32 to vector<32x128xf32>
    %237 = arith.select %233, %236, %231 : vector<32x128xi1>, vector<32x128xf32>
    %c4_i32_30 = arith.constant 4 : i32
    %238 = vector.broadcast %c4_i32_30 : i32 to vector<32x128xi32>
    %239 = arith.cmpi eq, %212, %238 : vector<32x128xi32>
    %240 = arith.index_cast %c4_i32_30 : i32 to index
    %241 = memref.load %arg2[%240] : memref<16xf32, #tpu.memory_space<smem>>
    %242 = vector.broadcast %241 : f32 to vector<32x128xf32>
    %243 = arith.select %239, %242, %237 : vector<32x128xi1>, vector<32x128xf32>
    %c5_i32_31 = arith.constant 5 : i32
    %244 = vector.broadcast %c5_i32_31 : i32 to vector<32x128xi32>
    %245 = arith.cmpi eq, %212, %244 : vector<32x128xi32>
    %246 = arith.index_cast %c5_i32_31 : i32 to index
    %247 = memref.load %arg2[%246] : memref<16xf32, #tpu.memory_space<smem>>
    %248 = vector.broadcast %247 : f32 to vector<32x128xf32>
    %249 = arith.select %245, %248, %243 : vector<32x128xi1>, vector<32x128xf32>
    %c6_i32_32 = arith.constant 6 : i32
    %250 = vector.broadcast %c6_i32_32 : i32 to vector<32x128xi32>
    %251 = arith.cmpi eq, %212, %250 : vector<32x128xi32>
    %252 = arith.index_cast %c6_i32_32 : i32 to index
    %253 = memref.load %arg2[%252] : memref<16xf32, #tpu.memory_space<smem>>
    %254 = vector.broadcast %253 : f32 to vector<32x128xf32>
    %255 = arith.select %251, %254, %249 : vector<32x128xi1>, vector<32x128xf32>
    %c7_i32_33 = arith.constant 7 : i32
    %256 = vector.broadcast %c7_i32_33 : i32 to vector<32x128xi32>
    %257 = arith.cmpi eq, %212, %256 : vector<32x128xi32>
    %258 = arith.index_cast %c7_i32_33 : i32 to index
    %259 = memref.load %arg2[%258] : memref<16xf32, #tpu.memory_space<smem>>
    %260 = vector.broadcast %259 : f32 to vector<32x128xf32>
    %261 = arith.select %257, %260, %255 : vector<32x128xi1>, vector<32x128xf32>
    %c8_i32_34 = arith.constant 8 : i32
    %262 = vector.broadcast %c8_i32_34 : i32 to vector<32x128xi32>
    %263 = arith.cmpi eq, %212, %262 : vector<32x128xi32>
    %264 = arith.index_cast %c8_i32_34 : i32 to index
    %265 = memref.load %arg2[%264] : memref<16xf32, #tpu.memory_space<smem>>
    %266 = vector.broadcast %265 : f32 to vector<32x128xf32>
    %267 = arith.select %263, %266, %261 : vector<32x128xi1>, vector<32x128xf32>
    %c9_i32_35 = arith.constant 9 : i32
    %268 = vector.broadcast %c9_i32_35 : i32 to vector<32x128xi32>
    %269 = arith.cmpi eq, %212, %268 : vector<32x128xi32>
    %270 = arith.index_cast %c9_i32_35 : i32 to index
    %271 = memref.load %arg2[%270] : memref<16xf32, #tpu.memory_space<smem>>
    %272 = vector.broadcast %271 : f32 to vector<32x128xf32>
    %273 = arith.select %269, %272, %267 : vector<32x128xi1>, vector<32x128xf32>
    %c10_i32_36 = arith.constant 10 : i32
    %274 = vector.broadcast %c10_i32_36 : i32 to vector<32x128xi32>
    %275 = arith.cmpi eq, %212, %274 : vector<32x128xi32>
    %276 = arith.index_cast %c10_i32_36 : i32 to index
    %277 = memref.load %arg2[%276] : memref<16xf32, #tpu.memory_space<smem>>
    %278 = vector.broadcast %277 : f32 to vector<32x128xf32>
    %279 = arith.select %275, %278, %273 : vector<32x128xi1>, vector<32x128xf32>
    %c11_i32_37 = arith.constant 11 : i32
    %280 = vector.broadcast %c11_i32_37 : i32 to vector<32x128xi32>
    %281 = arith.cmpi eq, %212, %280 : vector<32x128xi32>
    %282 = arith.index_cast %c11_i32_37 : i32 to index
    %283 = memref.load %arg2[%282] : memref<16xf32, #tpu.memory_space<smem>>
    %284 = vector.broadcast %283 : f32 to vector<32x128xf32>
    %285 = arith.select %281, %284, %279 : vector<32x128xi1>, vector<32x128xf32>
    %c12_i32_38 = arith.constant 12 : i32
    %286 = vector.broadcast %c12_i32_38 : i32 to vector<32x128xi32>
    %287 = arith.cmpi eq, %212, %286 : vector<32x128xi32>
    %288 = arith.index_cast %c12_i32_38 : i32 to index
    %289 = memref.load %arg2[%288] : memref<16xf32, #tpu.memory_space<smem>>
    %290 = vector.broadcast %289 : f32 to vector<32x128xf32>
    %291 = arith.select %287, %290, %285 : vector<32x128xi1>, vector<32x128xf32>
    %c13_i32_39 = arith.constant 13 : i32
    %292 = vector.broadcast %c13_i32_39 : i32 to vector<32x128xi32>
    %293 = arith.cmpi eq, %212, %292 : vector<32x128xi32>
    %294 = arith.index_cast %c13_i32_39 : i32 to index
    %295 = memref.load %arg2[%294] : memref<16xf32, #tpu.memory_space<smem>>
    %296 = vector.broadcast %295 : f32 to vector<32x128xf32>
    %297 = arith.select %293, %296, %291 : vector<32x128xi1>, vector<32x128xf32>
    %c14_i32_40 = arith.constant 14 : i32
    %298 = vector.broadcast %c14_i32_40 : i32 to vector<32x128xi32>
    %299 = arith.cmpi eq, %212, %298 : vector<32x128xi32>
    %300 = arith.index_cast %c14_i32_40 : i32 to index
    %301 = memref.load %arg2[%300] : memref<16xf32, #tpu.memory_space<smem>>
    %302 = vector.broadcast %301 : f32 to vector<32x128xf32>
    %303 = arith.select %299, %302, %297 : vector<32x128xi1>, vector<32x128xf32>
    %c15_i32_41 = arith.constant 15 : i32
    %304 = vector.broadcast %c15_i32_41 : i32 to vector<32x128xi32>
    %305 = arith.cmpi eq, %212, %304 : vector<32x128xi32>
    %306 = arith.index_cast %c15_i32_41 : i32 to index
    %307 = memref.load %arg2[%306] : memref<16xf32, #tpu.memory_space<smem>>
    %308 = vector.broadcast %307 : f32 to vector<32x128xf32>
    %309 = arith.select %305, %308, %303 : vector<32x128xi1>, vector<32x128xf32>
    %c16_i32_42 = arith.constant 16 : i32
    %310 = arith.addf %208, %309 : vector<32x128xf32>
    %c3 = arith.constant 3 : index
    %311 = arith.index_cast %3 : i32 to index
    %c0_43 = arith.constant 0 : index
    %312 = vector.load %arg1[%c3, %311, %c0_43] : memref<5x32x128xi8, #tpu.memory_space<vmem>>, vector<1x32x128xi8>
    %313 = vector.shape_cast %312 : vector<1x32x128xi8> to vector<32x128xi8>
    %314 = arith.extsi %313 : vector<32x128xi8> to vector<32x128xi32>
    %cst_44 = arith.constant 0.000000e+00 : f32
    %315 = vector.broadcast %cst_44 : f32 to vector<32x128xf32>
    %c0_i32_45 = arith.constant 0 : i32
    %316 = vector.broadcast %c0_i32_45 : i32 to vector<32x128xi32>
    %317 = arith.cmpi eq, %314, %316 : vector<32x128xi32>
    %318 = arith.index_cast %c0_i32_45 : i32 to index
    %319 = memref.load %arg2[%318] : memref<16xf32, #tpu.memory_space<smem>>
    %320 = vector.broadcast %319 : f32 to vector<32x128xf32>
    %321 = arith.select %317, %320, %315 : vector<32x128xi1>, vector<32x128xf32>
    %c1_i32_46 = arith.constant 1 : i32
    %322 = vector.broadcast %c1_i32_46 : i32 to vector<32x128xi32>
    %323 = arith.cmpi eq, %314, %322 : vector<32x128xi32>
    %324 = arith.index_cast %c1_i32_46 : i32 to index
    %325 = memref.load %arg2[%324] : memref<16xf32, #tpu.memory_space<smem>>
    %326 = vector.broadcast %325 : f32 to vector<32x128xf32>
    %327 = arith.select %323, %326, %321 : vector<32x128xi1>, vector<32x128xf32>
    %c2_i32_47 = arith.constant 2 : i32
    %328 = vector.broadcast %c2_i32_47 : i32 to vector<32x128xi32>
    %329 = arith.cmpi eq, %314, %328 : vector<32x128xi32>
    %330 = arith.index_cast %c2_i32_47 : i32 to index
    %331 = memref.load %arg2[%330] : memref<16xf32, #tpu.memory_space<smem>>
    %332 = vector.broadcast %331 : f32 to vector<32x128xf32>
    %333 = arith.select %329, %332, %327 : vector<32x128xi1>, vector<32x128xf32>
    %c3_i32_48 = arith.constant 3 : i32
    %334 = vector.broadcast %c3_i32_48 : i32 to vector<32x128xi32>
    %335 = arith.cmpi eq, %314, %334 : vector<32x128xi32>
    %336 = arith.index_cast %c3_i32_48 : i32 to index
    %337 = memref.load %arg2[%336] : memref<16xf32, #tpu.memory_space<smem>>
    %338 = vector.broadcast %337 : f32 to vector<32x128xf32>
    %339 = arith.select %335, %338, %333 : vector<32x128xi1>, vector<32x128xf32>
    %c4_i32_49 = arith.constant 4 : i32
    %340 = vector.broadcast %c4_i32_49 : i32 to vector<32x128xi32>
    %341 = arith.cmpi eq, %314, %340 : vector<32x128xi32>
    %342 = arith.index_cast %c4_i32_49 : i32 to index
    %343 = memref.load %arg2[%342] : memref<16xf32, #tpu.memory_space<smem>>
    %344 = vector.broadcast %343 : f32 to vector<32x128xf32>
    %345 = arith.select %341, %344, %339 : vector<32x128xi1>, vector<32x128xf32>
    %c5_i32_50 = arith.constant 5 : i32
    %346 = vector.broadcast %c5_i32_50 : i32 to vector<32x128xi32>
    %347 = arith.cmpi eq, %314, %346 : vector<32x128xi32>
    %348 = arith.index_cast %c5_i32_50 : i32 to index
    %349 = memref.load %arg2[%348] : memref<16xf32, #tpu.memory_space<smem>>
    %350 = vector.broadcast %349 : f32 to vector<32x128xf32>
    %351 = arith.select %347, %350, %345 : vector<32x128xi1>, vector<32x128xf32>
    %c6_i32_51 = arith.constant 6 : i32
    %352 = vector.broadcast %c6_i32_51 : i32 to vector<32x128xi32>
    %353 = arith.cmpi eq, %314, %352 : vector<32x128xi32>
    %354 = arith.index_cast %c6_i32_51 : i32 to index
    %355 = memref.load %arg2[%354] : memref<16xf32, #tpu.memory_space<smem>>
    %356 = vector.broadcast %355 : f32 to vector<32x128xf32>
    %357 = arith.select %353, %356, %351 : vector<32x128xi1>, vector<32x128xf32>
    %c7_i32_52 = arith.constant 7 : i32
    %358 = vector.broadcast %c7_i32_52 : i32 to vector<32x128xi32>
    %359 = arith.cmpi eq, %314, %358 : vector<32x128xi32>
    %360 = arith.index_cast %c7_i32_52 : i32 to index
    %361 = memref.load %arg2[%360] : memref<16xf32, #tpu.memory_space<smem>>
    %362 = vector.broadcast %361 : f32 to vector<32x128xf32>
    %363 = arith.select %359, %362, %357 : vector<32x128xi1>, vector<32x128xf32>
    %c8_i32_53 = arith.constant 8 : i32
    %364 = vector.broadcast %c8_i32_53 : i32 to vector<32x128xi32>
    %365 = arith.cmpi eq, %314, %364 : vector<32x128xi32>
    %366 = arith.index_cast %c8_i32_53 : i32 to index
    %367 = memref.load %arg2[%366] : memref<16xf32, #tpu.memory_space<smem>>
    %368 = vector.broadcast %367 : f32 to vector<32x128xf32>
    %369 = arith.select %365, %368, %363 : vector<32x128xi1>, vector<32x128xf32>
    %c9_i32_54 = arith.constant 9 : i32
    %370 = vector.broadcast %c9_i32_54 : i32 to vector<32x128xi32>
    %371 = arith.cmpi eq, %314, %370 : vector<32x128xi32>
    %372 = arith.index_cast %c9_i32_54 : i32 to index
    %373 = memref.load %arg2[%372] : memref<16xf32, #tpu.memory_space<smem>>
    %374 = vector.broadcast %373 : f32 to vector<32x128xf32>
    %375 = arith.select %371, %374, %369 : vector<32x128xi1>, vector<32x128xf32>
    %c10_i32_55 = arith.constant 10 : i32
    %376 = vector.broadcast %c10_i32_55 : i32 to vector<32x128xi32>
    %377 = arith.cmpi eq, %314, %376 : vector<32x128xi32>
    %378 = arith.index_cast %c10_i32_55 : i32 to index
    %379 = memref.load %arg2[%378] : memref<16xf32, #tpu.memory_space<smem>>
    %380 = vector.broadcast %379 : f32 to vector<32x128xf32>
    %381 = arith.select %377, %380, %375 : vector<32x128xi1>, vector<32x128xf32>
    %c11_i32_56 = arith.constant 11 : i32
    %382 = vector.broadcast %c11_i32_56 : i32 to vector<32x128xi32>
    %383 = arith.cmpi eq, %314, %382 : vector<32x128xi32>
    %384 = arith.index_cast %c11_i32_56 : i32 to index
    %385 = memref.load %arg2[%384] : memref<16xf32, #tpu.memory_space<smem>>
    %386 = vector.broadcast %385 : f32 to vector<32x128xf32>
    %387 = arith.select %383, %386, %381 : vector<32x128xi1>, vector<32x128xf32>
    %c12_i32_57 = arith.constant 12 : i32
    %388 = vector.broadcast %c12_i32_57 : i32 to vector<32x128xi32>
    %389 = arith.cmpi eq, %314, %388 : vector<32x128xi32>
    %390 = arith.index_cast %c12_i32_57 : i32 to index
    %391 = memref.load %arg2[%390] : memref<16xf32, #tpu.memory_space<smem>>
    %392 = vector.broadcast %391 : f32 to vector<32x128xf32>
    %393 = arith.select %389, %392, %387 : vector<32x128xi1>, vector<32x128xf32>
    %c13_i32_58 = arith.constant 13 : i32
    %394 = vector.broadcast %c13_i32_58 : i32 to vector<32x128xi32>
    %395 = arith.cmpi eq, %314, %394 : vector<32x128xi32>
    %396 = arith.index_cast %c13_i32_58 : i32 to index
    %397 = memref.load %arg2[%396] : memref<16xf32, #tpu.memory_space<smem>>
    %398 = vector.broadcast %397 : f32 to vector<32x128xf32>
    %399 = arith.select %395, %398, %393 : vector<32x128xi1>, vector<32x128xf32>
    %c14_i32_59 = arith.constant 14 : i32
    %400 = vector.broadcast %c14_i32_59 : i32 to vector<32x128xi32>
    %401 = arith.cmpi eq, %314, %400 : vector<32x128xi32>
    %402 = arith.index_cast %c14_i32_59 : i32 to index
    %403 = memref.load %arg2[%402] : memref<16xf32, #tpu.memory_space<smem>>
    %404 = vector.broadcast %403 : f32 to vector<32x128xf32>
    %405 = arith.select %401, %404, %399 : vector<32x128xi1>, vector<32x128xf32>
    %c15_i32_60 = arith.constant 15 : i32
    %406 = vector.broadcast %c15_i32_60 : i32 to vector<32x128xi32>
    %407 = arith.cmpi eq, %314, %406 : vector<32x128xi32>
    %408 = arith.index_cast %c15_i32_60 : i32 to index
    %409 = memref.load %arg2[%408] : memref<16xf32, #tpu.memory_space<smem>>
    %410 = vector.broadcast %409 : f32 to vector<32x128xf32>
    %411 = arith.select %407, %410, %405 : vector<32x128xi1>, vector<32x128xf32>
    %c16_i32_61 = arith.constant 16 : i32
    %412 = arith.addf %310, %411 : vector<32x128xf32>
    %c4 = arith.constant 4 : index
    %413 = arith.index_cast %3 : i32 to index
    %c0_62 = arith.constant 0 : index
    %414 = vector.load %arg1[%c4, %413, %c0_62] : memref<5x32x128xi8, #tpu.memory_space<vmem>>, vector<1x32x128xi8>
    %415 = vector.shape_cast %414 : vector<1x32x128xi8> to vector<32x128xi8>
    %416 = arith.extsi %415 : vector<32x128xi8> to vector<32x128xi32>
    %cst_63 = arith.constant 0.000000e+00 : f32
    %417 = vector.broadcast %cst_63 : f32 to vector<32x128xf32>
    %c0_i32_64 = arith.constant 0 : i32
    %418 = vector.broadcast %c0_i32_64 : i32 to vector<32x128xi32>
    %419 = arith.cmpi eq, %416, %418 : vector<32x128xi32>
    %420 = arith.index_cast %c0_i32_64 : i32 to index
    %421 = memref.load %arg2[%420] : memref<16xf32, #tpu.memory_space<smem>>
    %422 = vector.broadcast %421 : f32 to vector<32x128xf32>
    %423 = arith.select %419, %422, %417 : vector<32x128xi1>, vector<32x128xf32>
    %c1_i32_65 = arith.constant 1 : i32
    %424 = vector.broadcast %c1_i32_65 : i32 to vector<32x128xi32>
    %425 = arith.cmpi eq, %416, %424 : vector<32x128xi32>
    %426 = arith.index_cast %c1_i32_65 : i32 to index
    %427 = memref.load %arg2[%426] : memref<16xf32, #tpu.memory_space<smem>>
    %428 = vector.broadcast %427 : f32 to vector<32x128xf32>
    %429 = arith.select %425, %428, %423 : vector<32x128xi1>, vector<32x128xf32>
    %c2_i32_66 = arith.constant 2 : i32
    %430 = vector.broadcast %c2_i32_66 : i32 to vector<32x128xi32>
    %431 = arith.cmpi eq, %416, %430 : vector<32x128xi32>
    %432 = arith.index_cast %c2_i32_66 : i32 to index
    %433 = memref.load %arg2[%432] : memref<16xf32, #tpu.memory_space<smem>>
    %434 = vector.broadcast %433 : f32 to vector<32x128xf32>
    %435 = arith.select %431, %434, %429 : vector<32x128xi1>, vector<32x128xf32>
    %c3_i32_67 = arith.constant 3 : i32
    %436 = vector.broadcast %c3_i32_67 : i32 to vector<32x128xi32>
    %437 = arith.cmpi eq, %416, %436 : vector<32x128xi32>
    %438 = arith.index_cast %c3_i32_67 : i32 to index
    %439 = memref.load %arg2[%438] : memref<16xf32, #tpu.memory_space<smem>>
    %440 = vector.broadcast %439 : f32 to vector<32x128xf32>
    %441 = arith.select %437, %440, %435 : vector<32x128xi1>, vector<32x128xf32>
    %c4_i32_68 = arith.constant 4 : i32
    %442 = vector.broadcast %c4_i32_68 : i32 to vector<32x128xi32>
    %443 = arith.cmpi eq, %416, %442 : vector<32x128xi32>
    %444 = arith.index_cast %c4_i32_68 : i32 to index
    %445 = memref.load %arg2[%444] : memref<16xf32, #tpu.memory_space<smem>>
    %446 = vector.broadcast %445 : f32 to vector<32x128xf32>
    %447 = arith.select %443, %446, %441 : vector<32x128xi1>, vector<32x128xf32>
    %c5_i32_69 = arith.constant 5 : i32
    %448 = vector.broadcast %c5_i32_69 : i32 to vector<32x128xi32>
    %449 = arith.cmpi eq, %416, %448 : vector<32x128xi32>
    %450 = arith.index_cast %c5_i32_69 : i32 to index
    %451 = memref.load %arg2[%450] : memref<16xf32, #tpu.memory_space<smem>>
    %452 = vector.broadcast %451 : f32 to vector<32x128xf32>
    %453 = arith.select %449, %452, %447 : vector<32x128xi1>, vector<32x128xf32>
    %c6_i32_70 = arith.constant 6 : i32
    %454 = vector.broadcast %c6_i32_70 : i32 to vector<32x128xi32>
    %455 = arith.cmpi eq, %416, %454 : vector<32x128xi32>
    %456 = arith.index_cast %c6_i32_70 : i32 to index
    %457 = memref.load %arg2[%456] : memref<16xf32, #tpu.memory_space<smem>>
    %458 = vector.broadcast %457 : f32 to vector<32x128xf32>
    %459 = arith.select %455, %458, %453 : vector<32x128xi1>, vector<32x128xf32>
    %c7_i32_71 = arith.constant 7 : i32
    %460 = vector.broadcast %c7_i32_71 : i32 to vector<32x128xi32>
    %461 = arith.cmpi eq, %416, %460 : vector<32x128xi32>
    %462 = arith.index_cast %c7_i32_71 : i32 to index
    %463 = memref.load %arg2[%462] : memref<16xf32, #tpu.memory_space<smem>>
    %464 = vector.broadcast %463 : f32 to vector<32x128xf32>
    %465 = arith.select %461, %464, %459 : vector<32x128xi1>, vector<32x128xf32>
    %c8_i32_72 = arith.constant 8 : i32
    %466 = vector.broadcast %c8_i32_72 : i32 to vector<32x128xi32>
    %467 = arith.cmpi eq, %416, %466 : vector<32x128xi32>
    %468 = arith.index_cast %c8_i32_72 : i32 to index
    %469 = memref.load %arg2[%468] : memref<16xf32, #tpu.memory_space<smem>>
    %470 = vector.broadcast %469 : f32 to vector<32x128xf32>
    %471 = arith.select %467, %470, %465 : vector<32x128xi1>, vector<32x128xf32>
    %c9_i32_73 = arith.constant 9 : i32
    %472 = vector.broadcast %c9_i32_73 : i32 to vector<32x128xi32>
    %473 = arith.cmpi eq, %416, %472 : vector<32x128xi32>
    %474 = arith.index_cast %c9_i32_73 : i32 to index
    %475 = memref.load %arg2[%474] : memref<16xf32, #tpu.memory_space<smem>>
    %476 = vector.broadcast %475 : f32 to vector<32x128xf32>
    %477 = arith.select %473, %476, %471 : vector<32x128xi1>, vector<32x128xf32>
    %c10_i32_74 = arith.constant 10 : i32
    %478 = vector.broadcast %c10_i32_74 : i32 to vector<32x128xi32>
    %479 = arith.cmpi eq, %416, %478 : vector<32x128xi32>
    %480 = arith.index_cast %c10_i32_74 : i32 to index
    %481 = memref.load %arg2[%480] : memref<16xf32, #tpu.memory_space<smem>>
    %482 = vector.broadcast %481 : f32 to vector<32x128xf32>
    %483 = arith.select %479, %482, %477 : vector<32x128xi1>, vector<32x128xf32>
    %c11_i32_75 = arith.constant 11 : i32
    %484 = vector.broadcast %c11_i32_75 : i32 to vector<32x128xi32>
    %485 = arith.cmpi eq, %416, %484 : vector<32x128xi32>
    %486 = arith.index_cast %c11_i32_75 : i32 to index
    %487 = memref.load %arg2[%486] : memref<16xf32, #tpu.memory_space<smem>>
    %488 = vector.broadcast %487 : f32 to vector<32x128xf32>
    %489 = arith.select %485, %488, %483 : vector<32x128xi1>, vector<32x128xf32>
    %c12_i32_76 = arith.constant 12 : i32
    %490 = vector.broadcast %c12_i32_76 : i32 to vector<32x128xi32>
    %491 = arith.cmpi eq, %416, %490 : vector<32x128xi32>
    %492 = arith.index_cast %c12_i32_76 : i32 to index
    %493 = memref.load %arg2[%492] : memref<16xf32, #tpu.memory_space<smem>>
    %494 = vector.broadcast %493 : f32 to vector<32x128xf32>
    %495 = arith.select %491, %494, %489 : vector<32x128xi1>, vector<32x128xf32>
    %c13_i32_77 = arith.constant 13 : i32
    %496 = vector.broadcast %c13_i32_77 : i32 to vector<32x128xi32>
    %497 = arith.cmpi eq, %416, %496 : vector<32x128xi32>
    %498 = arith.index_cast %c13_i32_77 : i32 to index
    %499 = memref.load %arg2[%498] : memref<16xf32, #tpu.memory_space<smem>>
    %500 = vector.broadcast %499 : f32 to vector<32x128xf32>
    %501 = arith.select %497, %500, %495 : vector<32x128xi1>, vector<32x128xf32>
    %c14_i32_78 = arith.constant 14 : i32
    %502 = vector.broadcast %c14_i32_78 : i32 to vector<32x128xi32>
    %503 = arith.cmpi eq, %416, %502 : vector<32x128xi32>
    %504 = arith.index_cast %c14_i32_78 : i32 to index
    %505 = memref.load %arg2[%504] : memref<16xf32, #tpu.memory_space<smem>>
    %506 = vector.broadcast %505 : f32 to vector<32x128xf32>
    %507 = arith.select %503, %506, %501 : vector<32x128xi1>, vector<32x128xf32>
    %c15_i32_79 = arith.constant 15 : i32
    %508 = vector.broadcast %c15_i32_79 : i32 to vector<32x128xi32>
    %509 = arith.cmpi eq, %416, %508 : vector<32x128xi32>
    %510 = arith.index_cast %c15_i32_79 : i32 to index
    %511 = memref.load %arg2[%510] : memref<16xf32, #tpu.memory_space<smem>>
    %512 = vector.broadcast %511 : f32 to vector<32x128xf32>
    %513 = arith.select %509, %512, %507 : vector<32x128xi1>, vector<32x128xf32>
    %c16_i32_80 = arith.constant 16 : i32
    %514 = arith.addf %412, %513 : vector<32x128xf32>
    %515 = arith.index_cast %3 : i32 to index
    %c0_81 = arith.constant 0 : index
    %516 = vector.load %arg3[%515, %c0_81] : memref<32x128xf32, #tpu.memory_space<vmem>>, vector<32x128xf32>
    tpu.vector_store %arg3[%515, %c0_81], %514 {strides = array<i32>} : memref<32x128xf32, #tpu.memory_space<vmem>>, vector<32x128xf32>,
    %c1_i32_82 = arith.constant 1 : i32
    return
  }
  func.func @transform_0(%arg0: i32) -> (i32, i32, i32) {
    %c0_i32 = arith.constant 0 : i32
    %c0_i32_0 = arith.constant 0 : i32
    %c0_i32_1 = arith.constant 0 : i32
    return %c0_i32, %arg0, %c0_i32_0 : i32, i32, i32
  }
  func.func @transform_1(%arg0: i32) -> i32 {
    %c0_i32 = arith.constant 0 : i32
    %c0_i32_0 = arith.constant 0 : i32
    return %c0_i32 : i32
  }
  func.func @transform_2(%arg0: i32) -> (i32, i32) {
    %c0_i32 = arith.constant 0 : i32
    %c0_i32_0 = arith.constant 0 : i32
    return %arg0, %c0_i32 : i32, i32
  }
}

</mosaic_0001>

<bundles_post_ra>
// kernel: tpu_custom_call.1
= control target key start
LH: loop header
LB: loop body
LE: loop exit
PB: predicated region body
PF: predicated region fallthrough
CT: control target
= control target key end

     0   :  { %7 = vsyncpa [#allocation3], 0  ;;  %s1759_s0 = inlined_call_operand.hbm [shape: s8[5,32,128], index: 0, kind: input, shape index: {}]   ;;  %s1760_s1 = inlined_call_operand.vmem [shape: f32[16], index: 1, kind: input, shape index: {}]   ;;  %s1761_s2 = inlined_call_operand.hbm [shape: f32[32,128], index: 2, kind: output, shape index: {}]  }
   0x1   :  { %8 = vsyncpa [#allocation5], 0 }
   0x2   :  { %9 = vsyncpa [#allocation4], 0  ;;  %s876_s9 = smov [#allocation2]   ;;  %s28_s13 = sshll.u32 %s1760_s1, 4  ;;  %s29_s13 = int_to_ptr.vmem [resolvable:$true] %s28_s13 }
   0x3   :  { %s15_s10 = sshll.u32 %s876_s9, 4  ;;  %s814_s16 = scalar_lea.hbm %s1759_s0, 640  ;;  %s16_s10 = int_to_ptr.vmem [resolvable:$true] %s15_s10 }
   0x4   :  { %p815_p0 = scmp.ne.s32.totalorder %s1759_s0, %s814_s16  ;;  %p818_p1 = scmp.lt.u32.totalorder %s814_s16, %s1759_s0 }
   0x6   :  { %p820_p2 = pnand %p818_p1, %p815_p0 }
   0x8   :  { %823 = shalt.err (!%p820_p2)
}
   0x9   :  { %s824_s21 = scalar_lea.vmem %s16_s10, 640  ;;  %p829_p4 = scmp.lt.s32.totalorder %s16_s10, %s16_s10 }
   0xa   :  { %p825_p3 = scmp.ne.s32.totalorder %s16_s10, %s824_s21  ;;  %p830_p5 = scmp.lt.s32.totalorder %s824_s21, %s824_s21 }
   0xc   :  { %p831_p6 = por %p830_p5, %p829_p4 }
   0xe   :  { %p832_p7 = pnand %p831_p6, %p825_p3 }
  0x10   :  { %835 = shalt.err (!%p832_p7)
}
  0x11   :  { %s877_s1 = smov 128   ;;  %s878_s22 = smov 8  }
  0x12   :  { %21 = dma.hbm_to_vmem [thread:$0]  %s1759_s0, 640, %s16_s10, [#allocation3], %s877_s1, %s877_s1, %s878_s22  }
  0x13   :  { %s836_s25 = scalar_lea.vmem %s29_s13, 16  ;;  %p841_p9 = scmp.lt.s32.totalorder %s29_s13, %s29_s13 }
  0x14   :  { %p837_p8 = scmp.ne.s32.totalorder %s29_s13, %s836_s25  ;;  %p842_p10 = scmp.lt.s32.totalorder %s836_s25, %s836_s25 }
  0x16   :  { %p843_p11 = por %p842_p10, %p841_p9 }
  0x18   :  { %p844_p12 = pnand %p843_p11, %p837_p8 }
  0x1a   :  { %847 = shalt.err (!%p844_p12)
}
  0x1b   :  { %s879_s26 = smov [#allocation6]  }
  0x1c   :  { %31 = dma.vmem_to_smem %s29_s13, 16, %s879_s26, [#allocation5]  }
  0x1d   :  { %870 = dma.done.wait [#allocation3], 640  }
  0x1e   :  { %871 = vsyncadd [#allocation3], 4294966656 }
  0x1f   :  { %872 = dma.done.wait [#allocation5], 16  }
  0x20   :  { %873 = vsyncadd [#allocation5], 4294967280 }
  0x21   :  { %38 = sfence }
  0x22   :  { %v39_v0 = vld [vmem:[#allocation2] sm:$0xff]  ;;  %s48_s27 = sld [smem:[#allocation6]]  ;;  %s794_s28 = sld [smem:[#allocation6 + $0x1]]  ;;  %v211_v1 = vld [vmem:[#allocation2 + $0x8] sm:$0xff] }
  0x23   :  { %v914_v2 = vunpack.c.0.s8 %v39_v0  ;;  %v916_v3 = vunpack.c.1.s8 %v39_v0  ;;  %v918_v4 = vunpack.c.2.s8 %v39_v0  ;;  %v920_v5 = vunpack.c.3.s8 %v39_v0  ;;  %s922_s0 = sld [smem:[#allocation6 + $0x2]]  ;;  %s924_s29 = sld [smem:[#allocation6 + $0x3]] }
  0x24   :  { %v926_v6 = vunpack.c.0.s8 %v211_v1  ;;  %v928_v7 = vunpack.c.1.s8 %v211_v1  ;;  %v930_v8 = vunpack.c.2.s8 %v211_v1  ;;  %v932_v9 = vunpack.c.3.s8 %v211_v1  ;;  %s946_s30 = sld [smem:[#allocation6 + $0x4]]  ;;  %s966_s3 = sld [smem:[#allocation6 + $0x5]] }
  0x25   :  { %vm44_vm0 = vcmp.eq.s32.totalorder %v914_v2, 0  ;;  %vm45_vm1 = vcmp.eq.s32.totalorder %v916_v3, 0  ;;  %vm46_vm2 = vcmp.eq.s32.totalorder %v918_v4, 0  ;;  %vm47_vm3 = vcmp.eq.s32.totalorder %v920_v5, 0  ;;  %s988_s4 = sld [smem:[#allocation6 + $0x6]]  ;;  %s1010_s5 = sld [smem:[#allocation6 + $0x7]] }
  0x26   :  { %vm54_vm4 = vcmp.eq.s32.totalorder %v914_v2, 1  ;;  %vm55_vm5 = vcmp.eq.s32.totalorder %v916_v3, 1  ;;  %vm56_vm6 = vcmp.eq.s32.totalorder %v918_v4, 1  ;;  %vm57_vm7 = vcmp.eq.s32.totalorder %v920_v5, 1  ;;  %s1026_s6 = sld [smem:[#allocation6 + $0x8]]  ;;  %s1038_s7 = sld [smem:[#allocation6 + $0x9]] }
  0x27   :  { %vm64_vm8 = vcmp.eq.s32.totalorder %v914_v2, 2  ;;  %vm65_vm9 = vcmp.eq.s32.totalorder %v916_v3, 2  ;;  %vm66_vm10 = vcmp.eq.s32.totalorder %v918_v4, 2  ;;  %vm67_vm11 = vcmp.eq.s32.totalorder %v920_v5, 2  ;;  %s1050_s8 = sld [smem:[#allocation6 + $0xa]]  ;;  %s1062_s9 = sld [smem:[#allocation6 + $0xb]] }
  0x28   :  { %v948_v10 = vstv %s48_s27  ;;  %v950_v11 = vstv %s794_s28  ;;  %vm74_vm12 = vcmp.eq.s32.totalorder %v914_v2, 3  ;;  %vm75_vm13 = vcmp.eq.s32.totalorder %v916_v3, 3  ;;  %s1078_s10 = sld [smem:[#allocation6 + $0xc]]  ;;  %s1090_s11 = sld [smem:[#allocation6 + $0xd]] }
  0x29   :  { %v50_v12 = vsel %vm44_vm0, %v948_v10, 0.0  ;;  %v51_v13 = vsel %vm45_vm1, %v948_v10, 0.0  ;;  %v52_v14 = vsel %vm46_vm2, %v948_v10, 0.0  ;;  %v53_v15 = vsel %vm47_vm3, %v948_v10, 0.0  ;;  %s1102_s12 = sld [smem:[#allocation6 + $0xe]]  ;;  %s1114_s13 = sld [smem:[#allocation6 + $0xf]] }
  0x2a   :  { %v60_v16 = vsel %vm54_vm4, %v950_v11, %v50_v12  ;;  %v61_v17 = vsel %vm55_vm5, %v950_v11, %v51_v13  ;;  %v62_v18 = vsel %vm56_vm6, %v950_v11, %v52_v14  ;;  %v63_v19 = vsel %vm57_vm7, %v950_v11, %v53_v15  ;;  %s880_s14 = smov [#allocation7]  }
  0x2b   :  { %v981_v20 = vstv %s922_s0  ;;  %vm76_vm14 = vcmp.eq.s32.totalorder %v918_v4, 3  ;;  %vm77_vm15 = vcmp.eq.s32.totalorder %v920_v5, 3  ;;  %v986_v21 = vstv %s924_s29  ;;  %s777_s15 = sshll.u32 %s880_s14, 4  ;;  %s778_s15 = int_to_ptr.vmem [resolvable:$true] %s777_s15 }
  0x2c   :  { %v70_v22 = vsel %vm64_vm8, %v981_v20, %v60_v16  ;;  %v71_v23 = vsel %vm65_vm9, %v981_v20, %v61_v17  ;;  %v72_v24 = vsel %vm66_vm10, %v981_v20, %v62_v18  ;;  %v73_v25 = vsel %vm67_vm11, %v981_v20, %v63_v19  ;;  %s848_s16 = scalar_lea.vmem %s778_s15, 512  ;;  %p853_p0 = scmp.lt.s32.totalorder %s778_s15, %s778_s15 }
  0x2d   :  { %v80_v26 = vsel %vm74_vm12, %v986_v21, %v70_v22  ;;  %v81_v27 = vsel %vm75_vm13, %v986_v21, %v71_v23  ;;  %v82_v28 = vsel %vm76_vm14, %v986_v21, %v72_v24  ;;  %v83_v29 = vsel %vm77_vm15, %v986_v21, %v73_v25  ;;  %p849_p13 = scmp.ne.s32.totalorder %s778_s15, %s848_s16  ;;  %p854_p1 = scmp.lt.s32.totalorder %s848_s16, %s848_s16 }
  0x2e   :  { %vm84_vm0 = vcmp.eq.s32.totalorder %v914_v2, 4  ;;  %vm85_vm1 = vcmp.eq.s32.totalorder %v916_v3, 4  ;;  %vm86_vm2 = vcmp.eq.s32.totalorder %v918_v4, 4  ;;  %vm87_vm3 = vcmp.eq.s32.totalorder %v920_v5, 4 }
  0x2f   :  { %v1017_v30 = vstv %s946_s30  ;;  %vm94_vm4 = vcmp.eq.s32.totalorder %v914_v2, 5  ;;  %vm95_vm5 = vcmp.eq.s32.totalorder %v916_v3, 5  ;;  %vm96_vm6 = vcmp.eq.s32.totalorder %v918_v4, 5  ;;  %p855_p2 = por %p854_p1, %p853_p0 }
  0x30   :  { %v90_v31 = vsel %vm84_vm0, %v1017_v30, %v80_v26  ;;  %v91_v32 = vsel %vm85_vm1, %v1017_v30, %v81_v27  ;;  %v92_v33 = vsel %vm86_vm2, %v1017_v30, %v82_v28  ;;  %v93_v34 = vsel %vm87_vm3, %v1017_v30, %v83_v29 }
  0x31   :  { %vm97_vm7 = vcmp.eq.s32.totalorder %v920_v5, 5  ;;  %v1030_v35 = vstv %s966_s3  ;;  %vm104_vm8 = vcmp.eq.s32.totalorder %v914_v2, 6  ;;  %vm105_vm9 = vcmp.eq.s32.totalorder %v916_v3, 6  ;;  %p856_p3 = pnand %p855_p2, %p849_p13 }
  0x32   :  { %v100_v36 = vsel %vm94_vm4, %v1030_v35, %v90_v31  ;;  %v101_v37 = vsel %vm95_vm5, %v1030_v35, %v91_v32  ;;  %v102_v38 = vsel %vm96_vm6, %v1030_v35, %v92_v33  ;;  %v103_v39 = vsel %vm97_vm7, %v1030_v35, %v93_v34 }
  0x33   :  { %vm106_vm10 = vcmp.eq.s32.totalorder %v918_v4, 6  ;;  %vm107_vm11 = vcmp.eq.s32.totalorder %v920_v5, 6  ;;  %v1043_v40 = vstv %s988_s4  ;;  %vm114_vm12 = vcmp.eq.s32.totalorder %v914_v2, 7 }
  0x34   :  { %v110_v41 = vsel %vm104_vm8, %v1043_v40, %v100_v36  ;;  %v111_v42 = vsel %vm105_vm9, %v1043_v40, %v101_v37  ;;  %v112_v43 = vsel %vm106_vm10, %v1043_v40, %v102_v38  ;;  %v113_v44 = vsel %vm107_vm11, %v1043_v40, %v103_v39 }
  0x35   :  { %vm115_vm13 = vcmp.eq.s32.totalorder %v916_v3, 7  ;;  %vm116_vm14 = vcmp.eq.s32.totalorder %v918_v4, 7  ;;  %vm117_vm15 = vcmp.eq.s32.totalorder %v920_v5, 7  ;;  %v1056_v45 = vstv %s1010_s5 }
  0x36   :  { %v120_v46 = vsel %vm114_vm12, %v1056_v45, %v110_v41  ;;  %v121_v47 = vsel %vm115_vm13, %v1056_v45, %v111_v42  ;;  %v122_v48 = vsel %vm116_vm14, %v1056_v45, %v112_v43  ;;  %v123_v49 = vsel %vm117_vm15, %v1056_v45, %v113_v44 }
  0x37   :  { %vm124_vm0 = vcmp.eq.s32.totalorder %v914_v2, 8  ;;  %vm125_vm1 = vcmp.eq.s32.totalorder %v916_v3, 8  ;;  %vm126_vm2 = vcmp.eq.s32.totalorder %v918_v4, 8  ;;  %vm127_vm3 = vcmp.eq.s32.totalorder %v920_v5, 8 }
  0x38   :  { %v1069_v50 = vstv %s1026_s6  ;;  %vm134_vm4 = vcmp.eq.s32.totalorder %v914_v2, 9  ;;  %vm135_vm5 = vcmp.eq.s32.totalorder %v916_v3, 9  ;;  %vm136_vm6 = vcmp.eq.s32.totalorder %v918_v4, 9 }
  0x39   :  { %v130_v51 = vsel %vm124_vm0, %v1069_v50, %v120_v46  ;;  %v131_v52 = vsel %vm125_vm1, %v1069_v50, %v121_v47  ;;  %v132_v53 = vsel %vm126_vm2, %v1069_v50, %v122_v48  ;;  %v133_v54 = vsel %vm127_vm3, %v1069_v50, %v123_v49 }
  0x3a   :  { %vm137_vm7 = vcmp.eq.s32.totalorder %v920_v5, 9  ;;  %v1082_v55 = vstv %s1038_s7  ;;  %vm144_vm8 = vcmp.eq.s32.totalorder %v914_v2, 10  ;;  %vm145_vm9 = vcmp.eq.s32.totalorder %v916_v3, 10 }
  0x3b   :  { %v140_v56 = vsel %vm134_vm4, %v1082_v55, %v130_v51  ;;  %v141_v57 = vsel %vm135_vm5, %v1082_v55, %v131_v52  ;;  %v142_v58 = vsel %vm136_vm6, %v1082_v55, %v132_v53  ;;  %v143_v59 = vsel %vm137_vm7, %v1082_v55, %v133_v54 }
  0x3c   :  { %vm146_vm10 = vcmp.eq.s32.totalorder %v918_v4, 10  ;;  %vm147_vm11 = vcmp.eq.s32.totalorder %v920_v5, 10  ;;  %v1095_v60 = vstv %s1050_s8  ;;  %vm154_vm12 = vcmp.eq.s32.totalorder %v914_v2, 11 }
  0x3d   :  { %v150_v61 = vsel %vm144_vm8, %v1095_v60, %v140_v56  ;;  %v151_v62 = vsel %vm145_vm9, %v1095_v60, %v141_v57  ;;  %v152_v63 = vsel %vm146_vm10, %v1095_v60, %v142_v58  ;;  %v153_v0 = vsel %vm147_vm11, %v1095_v60, %v143_v59 }
  0x3e   :  { %vm155_vm13 = vcmp.eq.s32.totalorder %v916_v3, 11  ;;  %vm156_vm14 = vcmp.eq.s32.totalorder %v918_v4, 11  ;;  %vm157_vm15 = vcmp.eq.s32.totalorder %v920_v5, 11  ;;  %v1108_v1 = vstv %s1062_s9 }
  0x3f   :  { %v160_v12 = vsel %vm154_vm12, %v1108_v1, %v150_v61  ;;  %v161_v13 = vsel %vm155_vm13, %v1108_v1, %v151_v62  ;;  %v162_v14 = vsel %vm156_vm14, %v1108_v1, %v152_v63  ;;  %v163_v15 = vsel %vm157_vm15, %v1108_v1, %v153_v0 }
  0x40   :  { %vm164_vm0 = vcmp.eq.s32.totalorder %v914_v2, 12  ;;  %vm165_vm1 = vcmp.eq.s32.totalorder %v916_v3, 12  ;;  %vm166_vm2 = vcmp.eq.s32.totalorder %v918_v4, 12  ;;  %vm167_vm3 = vcmp.eq.s32.totalorder %v920_v5, 12 }
  0x41   :  { %v1121_v16 = vstv %s1078_s10  ;;  %vm174_vm4 = vcmp.eq.s32.totalorder %v914_v2, 13  ;;  %vm175_vm5 = vcmp.eq.s32.totalorder %v916_v3, 13  ;;  %vm176_vm6 = vcmp.eq.s32.totalorder %v918_v4, 13 }
  0x42   :  { %v170_v17 = vsel %vm164_vm0, %v1121_v16, %v160_v12  ;;  %v171_v18 = vsel %vm165_vm1, %v1121_v16, %v161_v13  ;;  %v172_v19 = vsel %vm166_vm2, %v1121_v16, %v162_v14  ;;  %v173_v22 = vsel %vm167_vm3, %v1121_v16, %v163_v15 }
  0x43   :  { %vm177_vm7 = vcmp.eq.s32.totalorder %v920_v5, 13  ;;  %v1132_v23 = vstv %s1090_s11  ;;  %vm184_vm8 = vcmp.eq.s32.totalorder %v914_v2, 14  ;;  %vm185_vm9 = vcmp.eq.s32.totalorder %v916_v3, 14 }
  0x44   :  { %v180_v24 = vsel %vm174_vm4, %v1132_v23, %v170_v17  ;;  %v181_v25 = vsel %vm175_vm5, %v1132_v23, %v171_v18  ;;  %v182_v26 = vsel %vm176_vm6, %v1132_v23, %v172_v19  ;;  %v183_v27 = vsel %vm177_vm7, %v1132_v23, %v173_v22 }
  0x45   :  { %vm186_vm10 = vcmp.eq.s32.totalorder %v918_v4, 14  ;;  %vm187_vm11 = vcmp.eq.s32.totalorder %v920_v5, 14  ;;  %v1143_v28 = vstv %s1102_s12  ;;  %vm194_vm12 = vcmp.eq.s32.totalorder %v914_v2, 15 }
  0x46   :  { %v190_v29 = vsel %vm184_vm8, %v1143_v28, %v180_v24  ;;  %v191_v31 = vsel %vm185_vm9, %v1143_v28, %v181_v25  ;;  %v192_v32 = vsel %vm186_vm10, %v1143_v28, %v182_v26  ;;  %v193_v33 = vsel %vm187_vm11, %v1143_v28, %v183_v27 }
  0x47   :  { %vm195_vm13 = vcmp.eq.s32.totalorder %v916_v3, 15  ;;  %vm196_vm14 = vcmp.eq.s32.totalorder %v918_v4, 15  ;;  %vm197_vm15 = vcmp.eq.s32.totalorder %v920_v5, 15  ;;  %v1154_v34 = vstv %s1114_s13 }
  0x48   :  { %v1157_v36 = vsel %vm194_vm12, %v1154_v34, %v190_v29  ;;  %v1160_v2 = vsel %vm195_vm13, %v1154_v34, %v191_v31  ;;  %v1163_v37 = vsel %vm196_vm14, %v1154_v34, %v192_v32  ;;  %v1166_v38 = vsel %vm197_vm15, %v1154_v34, %v193_v33 }
  0x49   :  { %vm216_vm0 = vcmp.eq.s32.totalorder %v926_v6, 0  ;;  %vm217_vm1 = vcmp.eq.s32.totalorder %v928_v7, 0  ;;  %vm218_vm2 = vcmp.eq.s32.totalorder %v930_v8, 0  ;;  %vm219_vm3 = vcmp.eq.s32.totalorder %v932_v9, 0 }
  0x4a   :  { %v220_v3 = vsel %vm216_vm0, %v948_v10, 0.0  ;;  %v221_v4 = vsel %vm217_vm1, %v948_v10, 0.0  ;;  %v222_v5 = vsel %vm218_vm2, %v948_v10, 0.0  ;;  %v223_v39 = vsel %vm219_vm3, %v948_v10, 0.0 }
  0x4b   :  { %vm224_vm4 = vcmp.eq.s32.totalorder %v926_v6, 1  ;;  %vm225_vm5 = vcmp.eq.s32.totalorder %v928_v7, 1  ;;  %vm226_vm6 = vcmp.eq.s32.totalorder %v930_v8, 1  ;;  %vm227_vm7 = vcmp.eq.s32.totalorder %v932_v9, 1 }
  0x4c   :  { %v228_v41 = vsel %vm224_vm4, %v950_v11, %v220_v3  ;;  %v229_v42 = vsel %vm225_vm5, %v950_v11, %v221_v4  ;;  %v230_v43 = vsel %vm226_vm6, %v950_v11, %v222_v5  ;;  %v231_v44 = vsel %vm227_vm7, %v950_v11, %v223_v39 }
  0x4d   :  { %vm232_vm8 = vcmp.eq.s32.totalorder %v926_v6, 2  ;;  %vm233_vm9 = vcmp.eq.s32.totalorder %v928_v7, 2  ;;  %vm234_vm10 = vcmp.eq.s32.totalorder %v930_v8, 2  ;;  %vm235_vm11 = vcmp.eq.s32.totalorder %v932_v9, 2 }
  0x4e   :  { %v236_v46 = vsel %vm232_vm8, %v981_v20, %v228_v41  ;;  %v237_v47 = vsel %vm233_vm9, %v981_v20, %v229_v42  ;;  %v238_v48 = vsel %vm234_vm10, %v981_v20, %v230_v43  ;;  %v239_v49 = vsel %vm235_vm11, %v981_v20, %v231_v44 }
  0x4f   :  { %vm240_vm12 = vcmp.eq.s32.totalorder %v926_v6, 3  ;;  %vm241_vm13 = vcmp.eq.s32.totalorder %v928_v7, 3  ;;  %vm242_vm14 = vcmp.eq.s32.totalorder %v930_v8, 3  ;;  %vm243_vm15 = vcmp.eq.s32.totalorder %v932_v9, 3 }
  0x50   :  { %v244_v51 = vsel %vm240_vm12, %v986_v21, %v236_v46  ;;  %v245_v52 = vsel %vm241_vm13, %v986_v21, %v237_v47  ;;  %v246_v53 = vsel %vm242_vm14, %v986_v21, %v238_v48  ;;  %v247_v54 = vsel %vm243_vm15, %v986_v21, %v239_v49 }
  0x51   :  { %vm248_vm0 = vcmp.eq.s32.totalorder %v926_v6, 4  ;;  %vm249_vm1 = vcmp.eq.s32.totalorder %v928_v7, 4  ;;  %vm250_vm2 = vcmp.eq.s32.totalorder %v930_v8, 4  ;;  %vm251_vm3 = vcmp.eq.s32.totalorder %v932_v9, 4 }
  0x52   :  { %v252_v56 = vsel %vm248_vm0, %v1017_v30, %v244_v51  ;;  %v253_v57 = vsel %vm249_vm1, %v1017_v30, %v245_v52  ;;  %v254_v58 = vsel %vm250_vm2, %v1017_v30, %v246_v53  ;;  %v255_v59 = vsel %vm251_vm3, %v1017_v30, %v247_v54 }
  0x53   :  { %vm256_vm4 = vcmp.eq.s32.totalorder %v926_v6, 5  ;;  %vm257_vm5 = vcmp.eq.s32.totalorder %v928_v7, 5  ;;  %vm258_vm6 = vcmp.eq.s32.totalorder %v930_v8, 5  ;;  %vm259_vm7 = vcmp.eq.s32.totalorder %v932_v9, 5 }
  0x54   :  { %v260_v61 = vsel %vm256_vm4, %v1030_v35, %v252_v56  ;;  %v261_v62 = vsel %vm257_vm5, %v1030_v35, %v253_v57  ;;  %v262_v63 = vsel %vm258_vm6, %v1030_v35, %v254_v58  ;;  %v263_v0 = vsel %vm259_vm7, %v1030_v35, %v255_v59 }
  0x55   :  { %vm264_vm8 = vcmp.eq.s32.totalorder %v926_v6, 6  ;;  %vm265_vm9 = vcmp.eq.s32.totalorder %v928_v7, 6  ;;  %vm266_vm10 = vcmp.eq.s32.totalorder %v930_v8, 6  ;;  %vm267_vm11 = vcmp.eq.s32.totalorder %v932_v9, 6 }
  0x56   :  { %v268_v12 = vsel %vm264_vm8, %v1043_v40, %v260_v61  ;;  %v269_v13 = vsel %vm265_vm9, %v1043_v40, %v261_v62  ;;  %v270_v14 = vsel %vm266_vm10, %v1043_v40, %v262_v63  ;;  %v271_v15 = vsel %vm267_vm11, %v1043_v40, %v263_v0  ;;  %v351_v61 = vld [vmem:[#allocation2 + $0x10] sm:$0xff] }
  0x57   :  { %vm272_vm12 = vcmp.eq.s32.totalorder %v926_v6, 7  ;;  %vm273_vm13 = vcmp.eq.s32.totalorder %v928_v7, 7  ;;  %vm274_vm14 = vcmp.eq.s32.totalorder %v930_v8, 7  ;;  %vm275_vm15 = vcmp.eq.s32.totalorder %v932_v9, 7 }
  0x58   :  { %v276_v17 = vsel %vm272_vm12, %v1056_v45, %v268_v12  ;;  %v277_v18 = vsel %vm273_vm13, %v1056_v45, %v269_v13  ;;  %v278_v19 = vsel %vm274_vm14, %v1056_v45, %v270_v14  ;;  %v279_v22 = vsel %vm275_vm15, %v1056_v45, %v271_v15  ;;  %v491_v13 = vld [vmem:[#allocation2 + $0x18] sm:$0xff] }
  0x59   :  { %vm280_vm0 = vcmp.eq.s32.totalorder %v926_v6, 8  ;;  %vm281_vm1 = vcmp.eq.s32.totalorder %v928_v7, 8  ;;  %vm282_vm2 = vcmp.eq.s32.totalorder %v930_v8, 8  ;;  %vm283_vm3 = vcmp.eq.s32.totalorder %v932_v9, 8 }
  0x5a   :  { %v284_v24 = vsel %vm280_vm0, %v1069_v50, %v276_v17  ;;  %v285_v25 = vsel %vm281_vm1, %v1069_v50, %v277_v18  ;;  %v286_v26 = vsel %vm282_vm2, %v1069_v50, %v278_v19  ;;  %v287_v27 = vsel %vm283_vm3, %v1069_v50, %v279_v22 }
  0x5b   :  { %vm288_vm4 = vcmp.eq.s32.totalorder %v926_v6, 9  ;;  %vm289_vm5 = vcmp.eq.s32.totalorder %v928_v7, 9  ;;  %vm290_vm6 = vcmp.eq.s32.totalorder %v930_v8, 9  ;;  %vm291_vm7 = vcmp.eq.s32.totalorder %v932_v9, 9 }
  0x5c   :  { %v292_v29 = vsel %vm288_vm4, %v1082_v55, %v284_v24  ;;  %v293_v31 = vsel %vm289_vm5, %v1082_v55, %v285_v25  ;;  %v294_v32 = vsel %vm290_vm6, %v1082_v55, %v286_v26  ;;  %v295_v33 = vsel %vm291_vm7, %v1082_v55, %v287_v27 }
  0x5d   :  { %vm296_vm8 = vcmp.eq.s32.totalorder %v926_v6, 10  ;;  %vm297_vm9 = vcmp.eq.s32.totalorder %v928_v7, 10  ;;  %vm298_vm10 = vcmp.eq.s32.totalorder %v930_v8, 10  ;;  %vm299_vm11 = vcmp.eq.s32.totalorder %v932_v9, 10 }
  0x5e   :  { %v300_v3 = vsel %vm296_vm8, %v1095_v60, %v292_v29  ;;  %v301_v4 = vsel %vm297_vm9, %v1095_v60, %v293_v31  ;;  %v302_v5 = vsel %vm298_vm10, %v1095_v60, %v294_v32  ;;  %v303_v39 = vsel %vm299_vm11, %v1095_v60, %v295_v33 }
  0x5f   :  { %vm304_vm12 = vcmp.eq.s32.totalorder %v926_v6, 11  ;;  %vm305_vm13 = vcmp.eq.s32.totalorder %v928_v7, 11  ;;  %vm306_vm14 = vcmp.eq.s32.totalorder %v930_v8, 11  ;;  %vm307_vm15 = vcmp.eq.s32.totalorder %v932_v9, 11 }
  0x60   :  { %v308_v41 = vsel %vm304_vm12, %v1108_v1, %v300_v3  ;;  %v309_v42 = vsel %vm305_vm13, %v1108_v1, %v301_v4  ;;  %v310_v43 = vsel %vm306_vm14, %v1108_v1, %v302_v5  ;;  %v311_v44 = vsel %vm307_vm15, %v1108_v1, %v303_v39 }
  0x61   :  { %vm312_vm0 = vcmp.eq.s32.totalorder %v926_v6, 12  ;;  %vm313_vm1 = vcmp.eq.s32.totalorder %v928_v7, 12  ;;  %vm314_vm2 = vcmp.eq.s32.totalorder %v930_v8, 12  ;;  %vm315_vm3 = vcmp.eq.s32.totalorder %v932_v9, 12 }
  0x62   :  { %v316_v46 = vsel %vm312_vm0, %v1121_v16, %v308_v41  ;;  %v317_v47 = vsel %vm313_vm1, %v1121_v16, %v309_v42  ;;  %v318_v48 = vsel %vm314_vm2, %v1121_v16, %v310_v43  ;;  %v319_v49 = vsel %vm315_vm3, %v1121_v16, %v311_v44 }
  0x63   :  { %vm320_vm4 = vcmp.eq.s32.totalorder %v926_v6, 13  ;;  %vm321_vm5 = vcmp.eq.s32.totalorder %v928_v7, 13  ;;  %vm322_vm6 = vcmp.eq.s32.totalorder %v930_v8, 13  ;;  %vm323_vm7 = vcmp.eq.s32.totalorder %v932_v9, 13 }
  0x64   :  { %v324_v51 = vsel %vm320_vm4, %v1132_v23, %v316_v46  ;;  %v325_v52 = vsel %vm321_vm5, %v1132_v23, %v317_v47  ;;  %v326_v53 = vsel %vm322_vm6, %v1132_v23, %v318_v48  ;;  %v327_v54 = vsel %vm323_vm7, %v1132_v23, %v319_v49 }
  0x65   :  { %vm328_vm8 = vcmp.eq.s32.totalorder %v926_v6, 14  ;;  %vm329_vm9 = vcmp.eq.s32.totalorder %v928_v7, 14  ;;  %vm330_vm10 = vcmp.eq.s32.totalorder %v930_v8, 14  ;;  %vm331_vm11 = vcmp.eq.s32.totalorder %v932_v9, 14 }
  0x66   :  { %v332_v56 = vsel %vm328_vm8, %v1143_v28, %v324_v51  ;;  %v333_v57 = vsel %vm329_vm9, %v1143_v28, %v325_v52  ;;  %v334_v58 = vsel %vm330_vm10, %v1143_v28, %v326_v53  ;;  %v335_v59 = vsel %vm331_vm11, %v1143_v28, %v327_v54 }
  0x67   :  { %vm336_vm12 = vcmp.eq.s32.totalorder %v926_v6, 15  ;;  %vm337_vm13 = vcmp.eq.s32.totalorder %v928_v7, 15  ;;  %vm338_vm14 = vcmp.eq.s32.totalorder %v930_v8, 15  ;;  %vm339_vm15 = vcmp.eq.s32.totalorder %v932_v9, 15 }
  0x68   :  { %v340_v62 = vsel %vm336_vm12, %v1154_v34, %v332_v56  ;;  %v341_v63 = vsel %vm337_vm13, %v1154_v34, %v333_v57  ;;  %v342_v0 = vsel %vm338_vm14, %v1154_v34, %v334_v58  ;;  %v343_v12 = vsel %vm339_vm15, %v1154_v34, %v335_v59 }
  0x69   :  { %v1297_v14 = vadd.f32 %v340_v62, %v1157_v36  ;;  %v1300_v6 = vadd.f32 %v341_v63, %v1160_v2  ;;  %v1303_v7 = vadd.f32 %v342_v0, %v1163_v37  ;;  %v1306_v8 = vadd.f32 %v343_v12, %v1166_v38 }
  0x6a   :  { %v1308_v9 = vunpack.c.0.s8 %v351_v61  ;;  %v1310_v15 = vunpack.c.1.s8 %v351_v61  ;;  %v1312_v17 = vunpack.c.2.s8 %v351_v61  ;;  %v1314_v18 = vunpack.c.3.s8 %v351_v61 }
  0x6b   :  { %v1316_v19 = vunpack.c.0.s8 %v491_v13  ;;  %v1318_v36 = vunpack.c.1.s8 %v491_v13  ;;  %v1320_v2 = vunpack.c.2.s8 %v491_v13  ;;  %v1322_v22 = vunpack.c.3.s8 %v491_v13 }
  0x6c   :  { %vm356_vm0 = vcmp.eq.s32.totalorder %v1308_v9, 0  ;;  %vm357_vm1 = vcmp.eq.s32.totalorder %v1310_v15, 0  ;;  %vm358_vm2 = vcmp.eq.s32.totalorder %v1312_v17, 0  ;;  %vm359_vm3 = vcmp.eq.s32.totalorder %v1314_v18, 0 }
  0x6d   :  { %v360_v37 = vsel %vm356_vm0, %v948_v10, 0.0  ;;  %v361_v38 = vsel %vm357_vm1, %v948_v10, 0.0  ;;  %v362_v24 = vsel %vm358_vm2, %v948_v10, 0.0  ;;  %v363_v25 = vsel %vm359_vm3, %v948_v10, 0.0 }
  0x6e   :  { %vm364_vm4 = vcmp.eq.s32.totalorder %v1308_v9, 1  ;;  %vm365_vm5 = vcmp.eq.s32.totalorder %v1310_v15, 1  ;;  %vm366_vm6 = vcmp.eq.s32.totalorder %v1312_v17, 1  ;;  %vm367_vm7 = vcmp.eq.s32.totalorder %v1314_v18, 1 }
  0x6f   :  { %v368_v26 = vsel %vm364_vm4, %v950_v11, %v360_v37  ;;  %v369_v27 = vsel %vm365_vm5, %v950_v11, %v361_v38  ;;  %v370_v29 = vsel %vm366_vm6, %v950_v11, %v362_v24  ;;  %v371_v31 = vsel %vm367_vm7, %v950_v11, %v363_v25 }
  0x70   :  { %vm372_vm8 = vcmp.eq.s32.totalorder %v1308_v9, 2  ;;  %vm373_vm9 = vcmp.eq.s32.totalorder %v1310_v15, 2  ;;  %vm374_vm10 = vcmp.eq.s32.totalorder %v1312_v17, 2  ;;  %vm375_vm11 = vcmp.eq.s32.totalorder %v1314_v18, 2 }
  0x71   :  { %v376_v32 = vsel %vm372_vm8, %v981_v20, %v368_v26  ;;  %v377_v33 = vsel %vm373_vm9, %v981_v20, %v369_v27  ;;  %v378_v3 = vsel %vm374_vm10, %v981_v20, %v370_v29  ;;  %v379_v4 = vsel %vm375_vm11, %v981_v20, %v371_v31 }
  0x72   :  { %vm380_vm12 = vcmp.eq.s32.totalorder %v1308_v9, 3  ;;  %vm381_vm13 = vcmp.eq.s32.totalorder %v1310_v15, 3  ;;  %vm382_vm14 = vcmp.eq.s32.totalorder %v1312_v17, 3  ;;  %vm383_vm15 = vcmp.eq.s32.totalorder %v1314_v18, 3 }
  0x73   :  { %v384_v5 = vsel %vm380_vm12, %v986_v21, %v376_v32  ;;  %v385_v39 = vsel %vm381_vm13, %v986_v21, %v377_v33  ;;  %v386_v41 = vsel %vm382_vm14, %v986_v21, %v378_v3  ;;  %v387_v42 = vsel %vm383_vm15, %v986_v21, %v379_v4 }
  0x74   :  { %vm388_vm0 = vcmp.eq.s32.totalorder %v1308_v9, 4  ;;  %vm389_vm1 = vcmp.eq.s32.totalorder %v1310_v15, 4  ;;  %vm390_vm2 = vcmp.eq.s32.totalorder %v1312_v17, 4  ;;  %vm391_vm3 = vcmp.eq.s32.totalorder %v1314_v18, 4 }
  0x75   :  { %v392_v43 = vsel %vm388_vm0, %v1017_v30, %v384_v5  ;;  %v393_v44 = vsel %vm389_vm1, %v1017_v30, %v385_v39  ;;  %v394_v46 = vsel %vm390_vm2, %v1017_v30, %v386_v41  ;;  %v395_v47 = vsel %vm391_vm3, %v1017_v30, %v387_v42 }
  0x76   :  { %vm396_vm4 = vcmp.eq.s32.totalorder %v1308_v9, 5  ;;  %vm397_vm5 = vcmp.eq.s32.totalorder %v1310_v15, 5  ;;  %vm398_vm6 = vcmp.eq.s32.totalorder %v1312_v17, 5  ;;  %vm399_vm7 = vcmp.eq.s32.totalorder %v1314_v18, 5 }
  0x77   :  { %v400_v48 = vsel %vm396_vm4, %v1030_v35, %v392_v43  ;;  %v401_v49 = vsel %vm397_vm5, %v1030_v35, %v393_v44  ;;  %v402_v51 = vsel %vm398_vm6, %v1030_v35, %v394_v46  ;;  %v403_v52 = vsel %vm399_vm7, %v1030_v35, %v395_v47 }
  0x78   :  { %vm404_vm8 = vcmp.eq.s32.totalorder %v1308_v9, 6  ;;  %vm405_vm9 = vcmp.eq.s32.totalorder %v1310_v15, 6  ;;  %vm406_vm10 = vcmp.eq.s32.totalorder %v1312_v17, 6  ;;  %vm407_vm11 = vcmp.eq.s32.totalorder %v1314_v18, 6 }
  0x79   :  { %v408_v53 = vsel %vm404_vm8, %v1043_v40, %v400_v48  ;;  %v409_v54 = vsel %vm405_vm9, %v1043_v40, %v401_v49  ;;  %v410_v56 = vsel %vm406_vm10, %v1043_v40, %v402_v51  ;;  %v411_v57 = vsel %vm407_vm11, %v1043_v40, %v403_v52 }
  0x7a   :  { %vm412_vm12 = vcmp.eq.s32.totalorder %v1308_v9, 7  ;;  %vm413_vm13 = vcmp.eq.s32.totalorder %v1310_v15, 7  ;;  %vm414_vm14 = vcmp.eq.s32.totalorder %v1312_v17, 7  ;;  %vm415_vm15 = vcmp.eq.s32.totalorder %v1314_v18, 7 }
  0x7b   :  { %v416_v58 = vsel %vm412_vm12, %v1056_v45, %v408_v53  ;;  %v417_v59 = vsel %vm413_vm13, %v1056_v45, %v409_v54  ;;  %v418_v61 = vsel %vm414_vm14, %v1056_v45, %v410_v56  ;;  %v419_v62 = vsel %vm415_vm15, %v1056_v45, %v411_v57 }
  0x7c   :  { %vm420_vm0 = vcmp.eq.s32.totalorder %v1308_v9, 8  ;;  %vm421_vm1 = vcmp.eq.s32.totalorder %v1310_v15, 8  ;;  %vm422_vm2 = vcmp.eq.s32.totalorder %v1312_v17, 8  ;;  %vm423_vm3 = vcmp.eq.s32.totalorder %v1314_v18, 8 }
  0x7d   :  { %v424_v63 = vsel %vm420_vm0, %v1069_v50, %v416_v58  ;;  %v425_v0 = vsel %vm421_vm1, %v1069_v50, %v417_v59  ;;  %v426_v12 = vsel %vm422_vm2, %v1069_v50, %v418_v61  ;;  %v427_v13 = vsel %vm423_vm3, %v1069_v50, %v419_v62 }
  0x7e   :  { %vm428_vm4 = vcmp.eq.s32.totalorder %v1308_v9, 9  ;;  %vm429_vm5 = vcmp.eq.s32.totalorder %v1310_v15, 9  ;;  %vm430_vm6 = vcmp.eq.s32.totalorder %v1312_v17, 9  ;;  %vm431_vm7 = vcmp.eq.s32.totalorder %v1314_v18, 9 }
  0x7f   :  { %v432_v37 = vsel %vm428_vm4, %v1082_v55, %v424_v63  ;;  %v433_v38 = vsel %vm429_vm5, %v1082_v55, %v425_v0  ;;  %v434_v24 = vsel %vm430_vm6, %v1082_v55, %v426_v12  ;;  %v435_v25 = vsel %vm431_vm7, %v1082_v55, %v427_v13 }
  0x80   :  { %vm436_vm8 = vcmp.eq.s32.totalorder %v1308_v9, 10  ;;  %vm437_vm9 = vcmp.eq.s32.totalorder %v1310_v15, 10  ;;  %vm438_vm10 = vcmp.eq.s32.totalorder %v1312_v17, 10  ;;  %vm439_vm11 = vcmp.eq.s32.totalorder %v1314_v18, 10 }
  0x81   :  { %v440_v26 = vsel %vm436_vm8, %v1095_v60, %v432_v37  ;;  %v441_v27 = vsel %vm437_vm9, %v1095_v60, %v433_v38  ;;  %v442_v29 = vsel %vm438_vm10, %v1095_v60, %v434_v24  ;;  %v443_v31 = vsel %vm439_vm11, %v1095_v60, %v435_v25 }
  0x82   :  { %vm444_vm12 = vcmp.eq.s32.totalorder %v1308_v9, 11  ;;  %vm445_vm13 = vcmp.eq.s32.totalorder %v1310_v15, 11  ;;  %vm446_vm14 = vcmp.eq.s32.totalorder %v1312_v17, 11  ;;  %vm447_vm15 = vcmp.eq.s32.totalorder %v1314_v18, 11 }
  0x83   :  { %v448_v32 = vsel %vm444_vm12, %v1108_v1, %v440_v26  ;;  %v449_v33 = vsel %vm445_vm13, %v1108_v1, %v441_v27  ;;  %v450_v3 = vsel %vm446_vm14, %v1108_v1, %v442_v29  ;;  %v451_v4 = vsel %vm447_vm15, %v1108_v1, %v443_v31 }
  0x84   :  { %vm452_vm0 = vcmp.eq.s32.totalorder %v1308_v9, 12  ;;  %vm453_vm1 = vcmp.eq.s32.totalorder %v1310_v15, 12  ;;  %vm454_vm2 = vcmp.eq.s32.totalorder %v1312_v17, 12  ;;  %vm455_vm3 = vcmp.eq.s32.totalorder %v1314_v18, 12 }
  0x85   :  { %v456_v5 = vsel %vm452_vm0, %v1121_v16, %v448_v32  ;;  %v457_v39 = vsel %vm453_vm1, %v1121_v16, %v449_v33  ;;  %v458_v41 = vsel %vm454_vm2, %v1121_v16, %v450_v3  ;;  %v459_v42 = vsel %vm455_vm3, %v1121_v16, %v451_v4 }
  0x86   :  { %vm460_vm4 = vcmp.eq.s32.totalorder %v1308_v9, 13  ;;  %vm461_vm5 = vcmp.eq.s32.totalorder %v1310_v15, 13  ;;  %vm462_vm6 = vcmp.eq.s32.totalorder %v1312_v17, 13  ;;  %vm463_vm7 = vcmp.eq.s32.totalorder %v1314_v18, 13 }
  0x87   :  { %v464_v43 = vsel %vm460_vm4, %v1132_v23, %v456_v5  ;;  %v465_v44 = vsel %vm461_vm5, %v1132_v23, %v457_v39  ;;  %v466_v46 = vsel %vm462_vm6, %v1132_v23, %v458_v41  ;;  %v467_v47 = vsel %vm463_vm7, %v1132_v23, %v459_v42 }
  0x88   :  { %vm468_vm8 = vcmp.eq.s32.totalorder %v1308_v9, 14  ;;  %vm469_vm9 = vcmp.eq.s32.totalorder %v1310_v15, 14  ;;  %vm470_vm10 = vcmp.eq.s32.totalorder %v1312_v17, 14  ;;  %vm471_vm11 = vcmp.eq.s32.totalorder %v1314_v18, 14 }
  0x89   :  { %v472_v48 = vsel %vm468_vm8, %v1143_v28, %v464_v43  ;;  %v473_v49 = vsel %vm469_vm9, %v1143_v28, %v465_v44  ;;  %v474_v51 = vsel %vm470_vm10, %v1143_v28, %v466_v46  ;;  %v475_v52 = vsel %vm471_vm11, %v1143_v28, %v467_v47 }
  0x8a   :  { %vm476_vm12 = vcmp.eq.s32.totalorder %v1308_v9, 15  ;;  %vm477_vm13 = vcmp.eq.s32.totalorder %v1310_v15, 15  ;;  %vm478_vm14 = vcmp.eq.s32.totalorder %v1312_v17, 15  ;;  %vm479_vm15 = vcmp.eq.s32.totalorder %v1314_v18, 15 }
  0x8b   :  { %v480_v53 = vsel %vm476_vm12, %v1154_v34, %v472_v48  ;;  %v481_v54 = vsel %vm477_vm13, %v1154_v34, %v473_v49  ;;  %v482_v56 = vsel %vm478_vm14, %v1154_v34, %v474_v51  ;;  %v483_v57 = vsel %vm479_vm15, %v1154_v34, %v475_v52 }
  0x8c   :  { %v1453_v58 = vadd.f32 %v480_v53, %v1297_v14  ;;  %v1456_v59 = vadd.f32 %v481_v54, %v1300_v6  ;;  %v1459_v9 = vadd.f32 %v482_v56, %v1303_v7  ;;  %v1462_v15 = vadd.f32 %v483_v57, %v1306_v8 }
  0x8d   :  { %vm496_vm0 = vcmp.eq.s32.totalorder %v1316_v19, 0  ;;  %vm497_vm1 = vcmp.eq.s32.totalorder %v1318_v36, 0  ;;  %vm498_vm2 = vcmp.eq.s32.totalorder %v1320_v2, 0  ;;  %vm499_vm3 = vcmp.eq.s32.totalorder %v1322_v22, 0 }
  0x8e   :  { %v500_v14 = vsel %vm496_vm0, %v948_v10, 0.0  ;;  %v501_v17 = vsel %vm497_vm1, %v948_v10, 0.0  ;;  %v502_v6 = vsel %vm498_vm2, %v948_v10, 0.0  ;;  %v503_v7 = vsel %vm499_vm3, %v948_v10, 0.0 }
  0x8f   :  { %vm504_vm4 = vcmp.eq.s32.totalorder %v1316_v19, 1  ;;  %vm505_vm5 = vcmp.eq.s32.totalorder %v1318_v36, 1  ;;  %vm506_vm6 = vcmp.eq.s32.totalorder %v1320_v2, 1  ;;  %vm507_vm7 = vcmp.eq.s32.totalorder %v1322_v22, 1 }
  0x90   :  { %v508_v8 = vsel %vm504_vm4, %v950_v11, %v500_v14  ;;  %v509_v18 = vsel %vm505_vm5, %v950_v11, %v501_v17  ;;  %v510_v61 = vsel %vm506_vm6, %v950_v11, %v502_v6  ;;  %v511_v62 = vsel %vm507_vm7, %v950_v11, %v503_v7 }
  0x91   :  { %vm512_vm8 = vcmp.eq.s32.totalorder %v1316_v19, 2  ;;  %vm513_vm9 = vcmp.eq.s32.totalorder %v1318_v36, 2  ;;  %vm514_vm10 = vcmp.eq.s32.totalorder %v1320_v2, 2  ;;  %vm515_vm11 = vcmp.eq.s32.totalorder %v1322_v22, 2 }
  0x92   :  { %v516_v63 = vsel %vm512_vm8, %v981_v20, %v508_v8  ;;  %v517_v0 = vsel %vm513_vm9, %v981_v20, %v509_v18  ;;  %v518_v12 = vsel %vm514_vm10, %v981_v20, %v510_v61  ;;  %v519_v13 = vsel %vm515_vm11, %v981_v20, %v511_v62 }
  0x93   :  { %vm520_vm12 = vcmp.eq.s32.totalorder %v1316_v19, 3  ;;  %vm521_vm13 = vcmp.eq.s32.totalorder %v1318_v36, 3  ;;  %vm522_vm14 = vcmp.eq.s32.totalorder %v1320_v2, 3  ;;  %vm523_vm15 = vcmp.eq.s32.totalorder %v1322_v22, 3 }
  0x94   :  { %v524_v37 = vsel %vm520_vm12, %v986_v21, %v516_v63  ;;  %v525_v38 = vsel %vm521_vm13, %v986_v21, %v517_v0  ;;  %v526_v24 = vsel %vm522_vm14, %v986_v21, %v518_v12  ;;  %v527_v25 = vsel %vm523_vm15, %v986_v21, %v519_v13 }
  0x95   :  { %vm528_vm0 = vcmp.eq.s32.totalorder %v1316_v19, 4  ;;  %vm529_vm1 = vcmp.eq.s32.totalorder %v1318_v36, 4  ;;  %vm530_vm2 = vcmp.eq.s32.totalorder %v1320_v2, 4  ;;  %vm531_vm3 = vcmp.eq.s32.totalorder %v1322_v22, 4 }
  0x96   :  { %v532_v26 = vsel %vm528_vm0, %v1017_v30, %v524_v37  ;;  %v533_v27 = vsel %vm529_vm1, %v1017_v30, %v525_v38  ;;  %v534_v29 = vsel %vm530_vm2, %v1017_v30, %v526_v24  ;;  %v535_v31 = vsel %vm531_vm3, %v1017_v30, %v527_v25 }
  0x97   :  { %vm536_vm4 = vcmp.eq.s32.totalorder %v1316_v19, 5  ;;  %vm537_vm5 = vcmp.eq.s32.totalorder %v1318_v36, 5  ;;  %vm538_vm6 = vcmp.eq.s32.totalorder %v1320_v2, 5  ;;  %vm539_vm7 = vcmp.eq.s32.totalorder %v1322_v22, 5 }
  0x98   :  { %v540_v32 = vsel %vm536_vm4, %v1030_v35, %v532_v26  ;;  %v541_v33 = vsel %vm537_vm5, %v1030_v35, %v533_v27  ;;  %v542_v3 = vsel %vm538_vm6, %v1030_v35, %v534_v29  ;;  %v543_v4 = vsel %vm539_vm7, %v1030_v35, %v535_v31 }
  0x99   :  { %vm544_vm8 = vcmp.eq.s32.totalorder %v1316_v19, 6  ;;  %vm545_vm9 = vcmp.eq.s32.totalorder %v1318_v36, 6  ;;  %vm546_vm10 = vcmp.eq.s32.totalorder %v1320_v2, 6  ;;  %vm547_vm11 = vcmp.eq.s32.totalorder %v1322_v22, 6 }
  0x9a   :  { %v548_v5 = vsel %vm544_vm8, %v1043_v40, %v540_v32  ;;  %v549_v39 = vsel %vm545_vm9, %v1043_v40, %v541_v33  ;;  %v550_v41 = vsel %vm546_vm10, %v1043_v40, %v542_v3  ;;  %v551_v42 = vsel %vm547_vm11, %v1043_v40, %v543_v4  ;;  %v631_v32 = vld [vmem:[#allocation2 + $0x20] sm:$0xff] }
  0x9b   :  { %vm552_vm12 = vcmp.eq.s32.totalorder %v1316_v19, 7  ;;  %vm553_vm13 = vcmp.eq.s32.totalorder %v1318_v36, 7  ;;  %vm554_vm14 = vcmp.eq.s32.totalorder %v1320_v2, 7  ;;  %vm555_vm15 = vcmp.eq.s32.totalorder %v1322_v22, 7 }
  0x9c   :  { %v556_v43 = vsel %vm552_vm12, %v1056_v45, %v548_v5  ;;  %v557_v44 = vsel %vm553_vm13, %v1056_v45, %v549_v39  ;;  %v558_v46 = vsel %vm554_vm14, %v1056_v45, %v550_v41  ;;  %v559_v47 = vsel %vm555_vm15, %v1056_v45, %v551_v42 }
  0x9d   :  { %vm560_vm0 = vcmp.eq.s32.totalorder %v1316_v19, 8  ;;  %vm561_vm1 = vcmp.eq.s32.totalorder %v1318_v36, 8  ;;  %vm562_vm2 = vcmp.eq.s32.totalorder %v1320_v2, 8  ;;  %vm563_vm3 = vcmp.eq.s32.totalorder %v1322_v22, 8 }
  0x9e   :  { %v564_v48 = vsel %vm560_vm0, %v1069_v50, %v556_v43  ;;  %v565_v49 = vsel %vm561_vm1, %v1069_v50, %v557_v44  ;;  %v566_v51 = vsel %vm562_vm2, %v1069_v50, %v558_v46  ;;  %v567_v52 = vsel %vm563_vm3, %v1069_v50, %v559_v47 }
  0x9f   :  { %vm568_vm4 = vcmp.eq.s32.totalorder %v1316_v19, 9  ;;  %vm569_vm5 = vcmp.eq.s32.totalorder %v1318_v36, 9  ;;  %vm570_vm6 = vcmp.eq.s32.totalorder %v1320_v2, 9  ;;  %vm571_vm7 = vcmp.eq.s32.totalorder %v1322_v22, 9 }
  0xa0   :  { %v572_v53 = vsel %vm568_vm4, %v1082_v55, %v564_v48  ;;  %v573_v54 = vsel %vm569_vm5, %v1082_v55, %v565_v49  ;;  %v574_v56 = vsel %vm570_vm6, %v1082_v55, %v566_v51  ;;  %v575_v57 = vsel %vm571_vm7, %v1082_v55, %v567_v52 }
  0xa1   :  { %vm576_vm8 = vcmp.eq.s32.totalorder %v1316_v19, 10  ;;  %vm577_vm9 = vcmp.eq.s32.totalorder %v1318_v36, 10  ;;  %vm578_vm10 = vcmp.eq.s32.totalorder %v1320_v2, 10  ;;  %vm579_vm11 = vcmp.eq.s32.totalorder %v1322_v22, 10 }
  0xa2   :  { %v580_v14 = vsel %vm576_vm8, %v1095_v60, %v572_v53  ;;  %v581_v17 = vsel %vm577_vm9, %v1095_v60, %v573_v54  ;;  %v582_v6 = vsel %vm578_vm10, %v1095_v60, %v574_v56  ;;  %v583_v7 = vsel %vm579_vm11, %v1095_v60, %v575_v57 }
  0xa3   :  { %vm584_vm12 = vcmp.eq.s32.totalorder %v1316_v19, 11  ;;  %vm585_vm13 = vcmp.eq.s32.totalorder %v1318_v36, 11  ;;  %vm586_vm14 = vcmp.eq.s32.totalorder %v1320_v2, 11  ;;  %vm587_vm15 = vcmp.eq.s32.totalorder %v1322_v22, 11 }
  0xa4   :  { %v588_v8 = vsel %vm584_vm12, %v1108_v1, %v580_v14  ;;  %v589_v18 = vsel %vm585_vm13, %v1108_v1, %v581_v17  ;;  %v590_v61 = vsel %vm586_vm14, %v1108_v1, %v582_v6  ;;  %v591_v62 = vsel %vm587_vm15, %v1108_v1, %v583_v7 }
  0xa5   :  { %vm592_vm0 = vcmp.eq.s32.totalorder %v1316_v19, 12  ;;  %vm593_vm1 = vcmp.eq.s32.totalorder %v1318_v36, 12  ;;  %vm594_vm2 = vcmp.eq.s32.totalorder %v1320_v2, 12  ;;  %vm595_vm3 = vcmp.eq.s32.totalorder %v1322_v22, 12 }
  0xa6   :  { %v596_v63 = vsel %vm592_vm0, %v1121_v16, %v588_v8  ;;  %v597_v0 = vsel %vm593_vm1, %v1121_v16, %v589_v18  ;;  %v598_v12 = vsel %vm594_vm2, %v1121_v16, %v590_v61  ;;  %v599_v13 = vsel %vm595_vm3, %v1121_v16, %v591_v62 }
  0xa7   :  { %vm600_vm4 = vcmp.eq.s32.totalorder %v1316_v19, 13  ;;  %vm601_vm5 = vcmp.eq.s32.totalorder %v1318_v36, 13  ;;  %vm602_vm6 = vcmp.eq.s32.totalorder %v1320_v2, 13  ;;  %vm603_vm7 = vcmp.eq.s32.totalorder %v1322_v22, 13 }
  0xa8   :  { %v604_v37 = vsel %vm600_vm4, %v1132_v23, %v596_v63  ;;  %v605_v38 = vsel %vm601_vm5, %v1132_v23, %v597_v0  ;;  %v606_v24 = vsel %vm602_vm6, %v1132_v23, %v598_v12  ;;  %v607_v25 = vsel %vm603_vm7, %v1132_v23, %v599_v13 }
  0xa9   :  { %vm608_vm8 = vcmp.eq.s32.totalorder %v1316_v19, 14  ;;  %vm609_vm9 = vcmp.eq.s32.totalorder %v1318_v36, 14  ;;  %vm610_vm10 = vcmp.eq.s32.totalorder %v1320_v2, 14  ;;  %vm611_vm11 = vcmp.eq.s32.totalorder %v1322_v22, 14 }
  0xaa   :  { %v612_v26 = vsel %vm608_vm8, %v1143_v28, %v604_v37  ;;  %v613_v27 = vsel %vm609_vm9, %v1143_v28, %v605_v38  ;;  %v614_v29 = vsel %vm610_vm10, %v1143_v28, %v606_v24  ;;  %v615_v31 = vsel %vm611_vm11, %v1143_v28, %v607_v25 }
  0xab   :  { %vm616_vm12 = vcmp.eq.s32.totalorder %v1316_v19, 15  ;;  %vm617_vm13 = vcmp.eq.s32.totalorder %v1318_v36, 15  ;;  %vm618_vm14 = vcmp.eq.s32.totalorder %v1320_v2, 15  ;;  %vm619_vm15 = vcmp.eq.s32.totalorder %v1322_v22, 15 }
  0xac   :  { %v620_v33 = vsel %vm616_vm12, %v1154_v34, %v612_v26  ;;  %v621_v3 = vsel %vm617_vm13, %v1154_v34, %v613_v27  ;;  %v622_v4 = vsel %vm618_vm14, %v1154_v34, %v614_v29  ;;  %v623_v5 = vsel %vm619_vm15, %v1154_v34, %v615_v31 }
  0xad   :  { %v1592_v39 = vunpack.c.0.s8 %v631_v32  ;;  %v1594_v41 = vunpack.c.1.s8 %v631_v32  ;;  %v1596_v19 = vunpack.c.2.s8 %v631_v32  ;;  %v1598_v36 = vunpack.c.3.s8 %v631_v32 }
  0xae   :  { %v1601_v2 = vadd.f32 %v620_v33, %v1453_v58  ;;  %v1604_v22 = vadd.f32 %v621_v3, %v1456_v59  ;;  %v1607_v42 = vadd.f32 %v622_v4, %v1459_v9  ;;  %v1610_v43 = vadd.f32 %v623_v5, %v1462_v15 }
  0xaf   :  { %vm636_vm0 = vcmp.eq.s32.totalorder %v1592_v39, 0  ;;  %vm637_vm1 = vcmp.eq.s32.totalorder %v1594_v41, 0  ;;  %vm638_vm2 = vcmp.eq.s32.totalorder %v1596_v19, 0  ;;  %vm639_vm3 = vcmp.eq.s32.totalorder %v1598_v36, 0 }
  0xb0   :  { %v640_v58 = vsel %vm636_vm0, %v948_v10, 0.0  ;;  %v641_v44 = vsel %vm637_vm1, %v948_v10, 0.0  ;;  %v642_v59 = vsel %vm638_vm2, %v948_v10, 0.0  ;;  %v643_v9 = vsel %vm639_vm3, %v948_v10, 0.0 }
  0xb1   :  { %vm644_vm4 = vcmp.eq.s32.totalorder %v1592_v39, 1  ;;  %vm645_vm5 = vcmp.eq.s32.totalorder %v1594_v41, 1  ;;  %vm646_vm6 = vcmp.eq.s32.totalorder %v1596_v19, 1  ;;  %vm647_vm7 = vcmp.eq.s32.totalorder %v1598_v36, 1 }
  0xb2   :  { %v648_v15 = vsel %vm644_vm4, %v950_v11, %v640_v58  ;;  %v649_v46 = vsel %vm645_vm5, %v950_v11, %v641_v44  ;;  %v650_v47 = vsel %vm646_vm6, %v950_v11, %v642_v59  ;;  %v651_v48 = vsel %vm647_vm7, %v950_v11, %v643_v9 }
  0xb3   :  { %vm652_vm8 = vcmp.eq.s32.totalorder %v1592_v39, 2  ;;  %vm653_vm9 = vcmp.eq.s32.totalorder %v1594_v41, 2  ;;  %vm654_vm10 = vcmp.eq.s32.totalorder %v1596_v19, 2  ;;  %vm655_vm11 = vcmp.eq.s32.totalorder %v1598_v36, 2 }
  0xb4   :  { %v656_v10 = vsel %vm652_vm8, %v981_v20, %v648_v15  ;;  %v657_v49 = vsel %vm653_vm9, %v981_v20, %v649_v46  ;;  %v658_v51 = vsel %vm654_vm10, %v981_v20, %v650_v47  ;;  %v659_v52 = vsel %vm655_vm11, %v981_v20, %v651_v48 }
  0xb5   :  { %vm660_vm12 = vcmp.eq.s32.totalorder %v1592_v39, 3  ;;  %vm661_vm13 = vcmp.eq.s32.totalorder %v1594_v41, 3  ;;  %vm662_vm14 = vcmp.eq.s32.totalorder %v1596_v19, 3  ;;  %vm663_vm15 = vcmp.eq.s32.totalorder %v1598_v36, 3 }
  0xb6   :  { %v664_v11 = vsel %vm660_vm12, %v986_v21, %v656_v10  ;;  %v665_v53 = vsel %vm661_vm13, %v986_v21, %v657_v49  ;;  %v666_v54 = vsel %vm662_vm14, %v986_v21, %v658_v51  ;;  %v667_v56 = vsel %vm663_vm15, %v986_v21, %v659_v52 }
  0xb7   :  { %vm668_vm0 = vcmp.eq.s32.totalorder %v1592_v39, 4  ;;  %vm669_vm1 = vcmp.eq.s32.totalorder %v1594_v41, 4  ;;  %vm670_vm2 = vcmp.eq.s32.totalorder %v1596_v19, 4  ;;  %vm671_vm3 = vcmp.eq.s32.totalorder %v1598_v36, 4 }
  0xb8   :  { %v672_v20 = vsel %vm668_vm0, %v1017_v30, %v664_v11  ;;  %v673_v57 = vsel %vm669_vm1, %v1017_v30, %v665_v53  ;;  %v674_v14 = vsel %vm670_vm2, %v1017_v30, %v666_v54  ;;  %v675_v17 = vsel %vm671_vm3, %v1017_v30, %v667_v56 }
  0xb9   :  { %vm676_vm4 = vcmp.eq.s32.totalorder %v1592_v39, 5  ;;  %vm677_vm5 = vcmp.eq.s32.totalorder %v1594_v41, 5  ;;  %vm678_vm6 = vcmp.eq.s32.totalorder %v1596_v19, 5  ;;  %vm679_vm7 = vcmp.eq.s32.totalorder %v1598_v36, 5 }
  0xba   :  { %v680_v21 = vsel %vm676_vm4, %v1030_v35, %v672_v20  ;;  %v681_v6 = vsel %vm677_vm5, %v1030_v35, %v673_v57  ;;  %v682_v7 = vsel %vm678_vm6, %v1030_v35, %v674_v14  ;;  %v683_v8 = vsel %vm679_vm7, %v1030_v35, %v675_v17 }
  0xbb   :  { %vm684_vm8 = vcmp.eq.s32.totalorder %v1592_v39, 6  ;;  %vm685_vm9 = vcmp.eq.s32.totalorder %v1594_v41, 6  ;;  %vm686_vm10 = vcmp.eq.s32.totalorder %v1596_v19, 6  ;;  %vm687_vm11 = vcmp.eq.s32.totalorder %v1598_v36, 6 }
  0xbc   :  { %v688_v30 = vsel %vm684_vm8, %v1043_v40, %v680_v21  ;;  %v689_v18 = vsel %vm685_vm9, %v1043_v40, %v681_v6  ;;  %v690_v61 = vsel %vm686_vm10, %v1043_v40, %v682_v7  ;;  %v691_v62 = vsel %vm687_vm11, %v1043_v40, %v683_v8 }
  0xbd   :  { %vm692_vm12 = vcmp.eq.s32.totalorder %v1592_v39, 7  ;;  %vm693_vm13 = vcmp.eq.s32.totalorder %v1594_v41, 7  ;;  %vm694_vm14 = vcmp.eq.s32.totalorder %v1596_v19, 7  ;;  %vm695_vm15 = vcmp.eq.s32.totalorder %v1598_v36, 7 }
  0xbe   :  { %v696_v35 = vsel %vm692_vm12, %v1056_v45, %v688_v30  ;;  %v697_v63 = vsel %vm693_vm13, %v1056_v45, %v689_v18  ;;  %v698_v0 = vsel %vm694_vm14, %v1056_v45, %v690_v61  ;;  %v699_v12 = vsel %vm695_vm15, %v1056_v45, %v691_v62 }
  0xbf   :  { %vm700_vm0 = vcmp.eq.s32.totalorder %v1592_v39, 8  ;;  %vm701_vm1 = vcmp.eq.s32.totalorder %v1594_v41, 8  ;;  %vm702_vm2 = vcmp.eq.s32.totalorder %v1596_v19, 8  ;;  %vm703_vm3 = vcmp.eq.s32.totalorder %v1598_v36, 8 }
  0xc0   :  { %v704_v40 = vsel %vm700_vm0, %v1069_v50, %v696_v35  ;;  %v705_v13 = vsel %vm701_vm1, %v1069_v50, %v697_v63  ;;  %v706_v37 = vsel %vm702_vm2, %v1069_v50, %v698_v0  ;;  %v707_v38 = vsel %vm703_vm3, %v1069_v50, %v699_v12 }
  0xc1   :  { %vm708_vm4 = vcmp.eq.s32.totalorder %v1592_v39, 9  ;;  %vm709_vm5 = vcmp.eq.s32.totalorder %v1594_v41, 9  ;;  %vm710_vm6 = vcmp.eq.s32.totalorder %v1596_v19, 9  ;;  %vm711_vm7 = vcmp.eq.s32.totalorder %v1598_v36, 9 }
  0xc2   :  { %v712_v45 = vsel %vm708_vm4, %v1082_v55, %v704_v40  ;;  %v713_v24 = vsel %vm709_vm5, %v1082_v55, %v705_v13  ;;  %v714_v25 = vsel %vm710_vm6, %v1082_v55, %v706_v37  ;;  %v715_v26 = vsel %vm711_vm7, %v1082_v55, %v707_v38 }
  0xc3   :  { %vm716_vm8 = vcmp.eq.s32.totalorder %v1592_v39, 10  ;;  %vm717_vm9 = vcmp.eq.s32.totalorder %v1594_v41, 10  ;;  %vm718_vm10 = vcmp.eq.s32.totalorder %v1596_v19, 10  ;;  %vm719_vm11 = vcmp.eq.s32.totalorder %v1598_v36, 10 }
  0xc4   :  { %v720_v50 = vsel %vm716_vm8, %v1095_v60, %v712_v45  ;;  %v721_v27 = vsel %vm717_vm9, %v1095_v60, %v713_v24  ;;  %v722_v29 = vsel %vm718_vm10, %v1095_v60, %v714_v25  ;;  %v723_v31 = vsel %vm719_vm11, %v1095_v60, %v715_v26 }
  0xc5   :  { %vm724_vm12 = vcmp.eq.s32.totalorder %v1592_v39, 11  ;;  %vm725_vm13 = vcmp.eq.s32.totalorder %v1594_v41, 11  ;;  %vm726_vm14 = vcmp.eq.s32.totalorder %v1596_v19, 11  ;;  %vm727_vm15 = vcmp.eq.s32.totalorder %v1598_v36, 11 }
  0xc6   :  { %v728_v55 = vsel %vm724_vm12, %v1108_v1, %v720_v50  ;;  %v729_v32 = vsel %vm725_vm13, %v1108_v1, %v721_v27  ;;  %v730_v33 = vsel %vm726_vm14, %v1108_v1, %v722_v29  ;;  %v731_v3 = vsel %vm727_vm15, %v1108_v1, %v723_v31 }
  0xc7   :  { %vm732_vm0 = vcmp.eq.s32.totalorder %v1592_v39, 12  ;;  %vm733_vm1 = vcmp.eq.s32.totalorder %v1594_v41, 12  ;;  %vm734_vm2 = vcmp.eq.s32.totalorder %v1596_v19, 12  ;;  %vm735_vm3 = vcmp.eq.s32.totalorder %v1598_v36, 12 }
  0xc8   :  { %v736_v60 = vsel %vm732_vm0, %v1121_v16, %v728_v55  ;;  %v737_v4 = vsel %vm733_vm1, %v1121_v16, %v729_v32  ;;  %v738_v5 = vsel %vm734_vm2, %v1121_v16, %v730_v33  ;;  %v739_v58 = vsel %vm735_vm3, %v1121_v16, %v731_v3 }
  0xc9   :  { %vm740_vm4 = vcmp.eq.s32.totalorder %v1592_v39, 13  ;;  %vm741_vm5 = vcmp.eq.s32.totalorder %v1594_v41, 13  ;;  %vm742_vm6 = vcmp.eq.s32.totalorder %v1596_v19, 13  ;;  %vm743_vm7 = vcmp.eq.s32.totalorder %v1598_v36, 13 }
  0xca   :  { %v744_v1 = vsel %vm740_vm4, %v1132_v23, %v736_v60  ;;  %v745_v44 = vsel %vm741_vm5, %v1132_v23, %v737_v4  ;;  %v746_v59 = vsel %vm742_vm6, %v1132_v23, %v738_v5  ;;  %v747_v9 = vsel %vm743_vm7, %v1132_v23, %v739_v58 }
  0xcb   :  { %vm748_vm8 = vcmp.eq.s32.totalorder %v1592_v39, 14  ;;  %vm749_vm9 = vcmp.eq.s32.totalorder %v1594_v41, 14  ;;  %vm750_vm10 = vcmp.eq.s32.totalorder %v1596_v19, 14  ;;  %vm751_vm11 = vcmp.eq.s32.totalorder %v1598_v36, 14 }
  0xcc   :  { %v752_v16 = vsel %vm748_vm8, %v1143_v28, %v744_v1  ;;  %v753_v15 = vsel %vm749_vm9, %v1143_v28, %v745_v44  ;;  %v754_v46 = vsel %vm750_vm10, %v1143_v28, %v746_v59  ;;  %v755_v47 = vsel %vm751_vm11, %v1143_v28, %v747_v9 }
  0xcd   :  { %vm756_vm12 = vcmp.eq.s32.totalorder %v1592_v39, 15  ;;  %vm757_vm13 = vcmp.eq.s32.totalorder %v1594_v41, 15  ;;  %vm758_vm14 = vcmp.eq.s32.totalorder %v1596_v19, 15  ;;  %vm759_vm15 = vcmp.eq.s32.totalorder %v1598_v36, 15 }
  0xce   :  { %v760_v23 = vsel %vm756_vm12, %v1154_v34, %v752_v16  ;;  %v761_v48 = vsel %vm757_vm13, %v1154_v34, %v753_v15  ;;  %v762_v10 = vsel %vm758_vm14, %v1154_v34, %v754_v46  ;;  %v763_v49 = vsel %vm759_vm15, %v1154_v34, %v755_v47 }
  0xcf   :  { %v764_v28 = vadd.f32 %v760_v23, %v1601_v2  ;;  %v765_v51 = vadd.f32 %v761_v48, %v1604_v22  ;;  %v766_v39 = vadd.f32 %v762_v10, %v1607_v42  ;;  %v767_v41 = vadd.f32 %v763_v49, %v1610_v43 }
  0xd1   :  { %768 = vst [vmem:[#allocation7] sm:$0xff] %v764_v28  ;;  %769 = vst [vmem:[#allocation7 + $0x8] sm:$0xff] %v765_v51 }
  0xd2   :  { %770 = vst [vmem:[#allocation7 + $0x10] sm:$0xff] %v766_v39  ;;  %771 = vst [vmem:[#allocation7 + $0x18] sm:$0xff] %v767_v41 }
  0xd3   :  { %859 = shalt.err (!%p856_p3)
}
  0xd4   :  { %s860_s19 = scalar_lea.hbm %s1761_s2, 512 }
  0xd5   :  { %p861_p4 = scmp.ne.s32.totalorder %s1761_s2, %s860_s19  ;;  %p864_p5 = scmp.lt.u32.totalorder %s860_s19, %s1761_s2 }
  0xd7   :  { %p866_p6 = pnand %p864_p5, %p861_p4 }
  0xd9   :  { %869 = shalt.err (!%p866_p6)
}
  0xda   :  { %783 = dma.vmem_to_hbm [thread:$0]  %s778_s15, 512, %s1761_s2, [#allocation4], %s877_s1, %s877_s1, %s878_s22  }
  0xdb   :  { %874 = dma.done.wait [#allocation4], 512  }
  0xdc   :  { %875 = vsyncadd [#allocation4], 4294966784 }
  0xdd   :  { %787 = vsyncpa [#allocation3], 1 }
  0xde   :  { %788 = vsyncpa [#allocation4], 1 }
  0xdf   :  { %789 = vsyncpa [#allocation5], 1 }

</bundles_post_ra>
